<compile_context>
chip_gen: v6e
topology: v6e:2x2x1
jax: 0.10.0
libtpu: 0.0.40
codegen_flags: <defaults>
</compile_context>

<pallas_src>
import numpy as np
import jax
import jax.numpy as jnp
from jax.experimental import pallas as pl
from jax.experimental.pallas import tpu as pltpu

# Synthetic sizes (play_cols / player_cols are empty in the source script, so
# we pick small deterministic widths consistent with the forward pass:
# 11 channels * 20 positions = 220 after the two convs).
P1 = 16            # len(play_cols)
C_IN = 8           # len(player_cols)
L_IN = 22          # conv input length
L1 = L_IN - 2      # length after conv1 (k=5, pad=1) and conv2 (k=3, pad=1) = 20
EPS = 1e-5
N_OUT = 199
N_OUT_PAD = 256    # lane-dense padded width of the final layer
TILE_B_MAX = 512   # batch tile: conservative for v7x (64 MiB VMEM / 32 MiB scoped)


# ---------------------------------------------------------------------------
# Kernels
# ---------------------------------------------------------------------------
def _frontend_kernel(x1_ref, xcol_ref,
                     wa1, ba1, wa2, ba2,
                     wc1, bc1, wc2, bc2,
                     wd1a, wd1b, bd1,
                     z1_ref):
    """x1 MLP + conv stack (as dense matmuls) + concat-folded Linear(320,480)."""
    f32 = jnp.float32

    # x1_dense: Linear(P1,200)+ReLU -> Linear(200,100)+ReLU
    h = jnp.dot(x1_ref[...], wa1[...], preferred_element_type=f32) + ba1[...]
    h = jnp.maximum(h, 0.0)
    h1 = jnp.dot(h, wa2[...], preferred_element_type=f32) + ba2[...]
    h1 = jnp.maximum(h1, 0.0)                               # (TB, 100)

    # x2_conv as two block-Toeplitz matmuls.  Pad columns of y1 are exactly
    # zero (zero weights + zero bias + ReLU), reproducing conv2's padding=1.
    y1 = jnp.dot(xcol_ref[...], wc1[...], preferred_element_type=f32) + bc1[...]
    y1 = jnp.maximum(y1, 0.0)                               # (TB, 484)
    h2 = jnp.dot(y1, wc2[...], preferred_element_type=f32) + bc2[...]
    h2 = jnp.maximum(h2, 0.0)                               # (TB, 220) == torch reshape order

    # torch.cat((h1, h2), 1) @ Wd1 + bd1, with Wd1 split along its input dim.
    z1_ref[...] = (jnp.dot(h1, wd1a[...], preferred_element_type=f32)
                   + jnp.dot(h2, wd1b[...], preferred_element_type=f32)
                   + bd1[...])


def _bn_relu_linear_kernel(z_ref, scale_ref, shift_ref, w_ref, b_ref, o_ref):
    """Folded BatchNorm (precomputed scale/shift) + ReLU + Linear."""
    a = jnp.maximum(z_ref[...] * scale_ref[...] + shift_ref[...], 0.0)
    o_ref[...] = jnp.dot(a, w_ref[...], preferred_element_type=jnp.float32) + b_ref[...]


def _bn_relu_linear_softmax_kernel(z_ref, scale_ref, shift_ref, w_ref, b_ref, o_ref):
    """Folded BatchNorm + ReLU + Linear(240,256-padded) + Softmax (f32)."""
    a = jnp.maximum(z_ref[...] * scale_ref[...] + shift_ref[...], 0.0)
    logits = jnp.dot(a, w_ref[...], preferred_element_type=jnp.float32) + b_ref[...]
    m = jnp.max(logits, axis=1, keepdims=True)
    e = jnp.exp(logits - m)          # padded lanes have bias -1e30 -> exp == 0
    o_ref[...] = e / jnp.sum(e, axis=1, keepdims=True)


# ---------------------------------------------------------------------------
# pallas_call plumbing
# ---------------------------------------------------------------------------
def _round_up(x, m):
    return (x + m - 1) // m * m


def _row_spec(tile_b, d):
    return pl.BlockSpec((tile_b, d), lambda t: (t, 0))


def _resident(shape):
    # Full-array block with a constant index -> fetched once, stays in VMEM.
    return pl.BlockSpec(shape, lambda t: (0, 0))


def _tiled_call(kernel, row_ins, const_ins, out_dim, tile_b):
    bp = row_ins[0].shape[0]
    grid = (bp // tile_b,)
    in_specs = ([_row_spec(tile_b, a.shape[1]) for a in row_ins]
                + [_resident(a.shape) for a in const_ins])
    return pl.pallas_call(
        kernel,
        out_shape=jax.ShapeDtypeStruct((bp, out_dim), jnp.float32),
        grid=grid,
        in_specs=in_specs,
        out_specs=_row_spec(tile_b, out_dim),
        compiler_params=pltpu.CompilerParams(dimension_semantics=("parallel",)),
    )(*row_ins, *const_ins)


def _bn_fold(z_valid, gamma, beta):
    """Training-mode BN over the true batch, folded into scale/shift (f32)."""
    mean = jnp.mean(z_valid, axis=0, keepdims=True)
    var = jnp.var(z_valid, axis=0, keepdims=True)           # biased, as torch BN forward
    scale = gamma * jax.lax.rsqrt(var + EPS)
    shift = beta - mean * scale
    return scale, shift


def mixture_nn_forward(x1, x2, params):
    p = params
    b = x1.shape[0]
    tile_b = TILE_B_MAX if b >= TILE_B_MAX else _round_up(b, 8)
    bp = _round_up(b, tile_b)

    # conv1 input: zero-pad (padding=1) and flatten channel-major -> (B, 192)
    xcol = jnp.pad(x2, ((0, 0), (0, 0), (1, 1))).reshape(b, C_IN * (L_IN + 2))
    if bp != b:
        x1 = jnp.pad(x1, ((0, bp - b), (0, 0)))
        xcol = jnp.pad(xcol, ((0, bp - b), (0, 0)))

    # Pass 1: fused front end -> pre-BN activations z1 (B, 480)
    z1 = _tiled_call(
        _frontend_kernel, [x1, xcol],
        [p["wa1"], p["ba1"], p["wa2"], p["ba2"],
         p["wc1"], p["bc1"], p["wc2"], p["bc2"],
         p["wd1a"], p["wd1b"], p["bd1"]],
        480, tile_b)

    # BN1 stats over the true batch only (padded rows excluded).
    s1, t1 = _bn_fold(z1[:b], p["g1"], p["be1"])

    # Pass 2: BN1+ReLU+Linear(480,240) -> z2
    z2 = _tiled_call(_bn_relu_linear_kernel, [z1],
                     [s1, t1, p["wd2"], p["bd2"]], 240, tile_b)

    # BN2 stats over the true batch only.
    s2, t2 = _bn_fold(z2[:b], p["g2"], p["be2"])

    # Pass 3: BN2+ReLU+Linear(240,256-padded)+Softmax
    out = _tiled_call(_bn_relu_linear_softmax_kernel, [z2],
                      [s2, t2, p["wd3"], p["bd3"]], N_OUT_PAD, tile_b)
    return out[:b, :N_OUT]


# ---------------------------------------------------------------------------
# Deterministic parameter init (PyTorch-default-style uniform bounds) and
# host-side preprocessing (Toeplitz conv matrices, concat split, lane padding)
# ---------------------------------------------------------------------------
def _linear(key, fan_in, fan_out):
    bound = 1.0 / float(fan_in) ** 0.5
    kw, kb = jax.random.split(key)
    w = jax.random.uniform(kw, (fan_in, fan_out), jnp.float32, -bound, bound)
    b = jax.random.uniform(kb, (1, fan_out), jnp.float32, -bound, bound)
    return w, b


def _conv1d(key, c_in, c_out, ksz):
    bound = 1.0 / float(c_in * ksz) ** 0.5
    kw, kb = jax.random.split(key)
    w = jax.random.uniform(kw, (c_out, c_in, ksz), jnp.float32, -bound, bound)
    b = jax.random.uniform(kb, (c_out,), jnp.float32, -bound, bound)
    return w, b


def _conv1d_as_dense(w, b, l_in, pad, out_pad):
    """Dense matrix/bias so that  x_pad_flat @ W + B  ==  Conv1d(w,b,padding=pad)(x)
    with the output laid out channel-major and optionally zero-padded by
    `out_pad` columns per channel (to serve as the next conv's padded input)."""
    w = np.asarray(w, np.float32)
    b = np.asarray(b, np.float32).reshape(-1)
    c_out, c_in, ksz = w.shape
    lp = l_in + 2 * pad
    l_out = lp - ksz + 1
    cols = l_out + 2 * out_pad
    dense = np.zeros((c_in * lp, c_out * cols), np.float32)
    bias = np.zeros((1, c_out * cols), np.float32)
    for k in range(ksz):
        for l in range(l_out):
            rows = np.arange(c_in) * lp + l + k
            cs = np.arange(c_out) * cols + l + out_pad
            dense[np.ix_(rows, cs)] = w[:, :, k].T          # [ci, co] = w[co, ci, k]
    for l in range(l_out):
        bias[0, np.arange(c_out) * cols + l + out_pad] = b
    return jnp.asarray(dense), jnp.asarray(bias)


def init_params(key):
    k = jax.random.split(key, 7)
    wa1, ba1 = _linear(k[0], P1, 200)
    wa2, ba2 = _linear(k[1], 200, 100)
    c1w, c1b = _conv1d(k[2], C_IN, 22, 5)
    c2w, c2b = _conv1d(k[3], 22, 11, 3)
    wd1, bd1 = _linear(k[4], 320, 480)
    wd2, bd2 = _linear(k[5], 480, 240)
    wd3, bd3 = _linear(k[6], 240, N_OUT)

    # conv1: input length 22, padding=1; output pre-padded by 1 per channel
    # (the zero columns reproduce conv2's padding=1).     (192, 484)
    wc1, bc1 = _conv1d_as_dense(c1w, c1b, L_IN, pad=1, out_pad=1)
    # conv2: its input is already the padded length-22 layout -> pad=0 here.
    # Output layout co*20+l matches torch .reshape(B, 220). (484, 220)
    wc2, bc2 = _conv1d_as_dense(c2w, c2b, L1 + 2, pad=0, out_pad=0)

    # Fold torch.cat((h1, h2), 1) into Linear(320,480): split along input dim.
    wd1a, wd1b = wd1[:100], wd1[100:]

    # Pad the final layer to 256 lanes: zero weights, -1e30 bias on pad lanes.
    wd3p = jnp.pad(wd3, ((0, 0), (0, N_OUT_PAD - N_OUT)))
    bd3p = jnp.pad(bd3, ((0, 0), (0, N_OUT_PAD - N_OUT)), constant_values=-1e30)

    return {
        "wa1": wa1, "ba1": ba1, "wa2": wa2, "ba2": ba2,
        "wc1": wc1, "bc1": bc1, "wc2": wc2, "bc2": bc2,
        "wd1a": wd1a, "wd1b": wd1b, "bd1": bd1,
        "g1": jnp.ones((1, 480), jnp.float32), "be1": jnp.zeros((1, 480), jnp.float32),
        "wd2": wd2, "bd2": bd2,
        "g2": jnp.ones((1, 240), jnp.float32), "be2": jnp.zeros((1, 240), jnp.float32),
        "wd3": wd3p, "bd3": bd3p,
    }


if __name__ == "__main__":
    key = jax.random.PRNGKey(0)
    k_params, k_x1, k_x2 = jax.random.split(key, 3)
    params = init_params(k_params)

    B = 2
    x1 = jax.random.normal(k_x1, (B, P1), jnp.float32)
    x2 = jax.random.normal(k_x2, (B, C_IN, L_IN), jnp.float32)

    fwd = jax.jit(mixture_nn_forward)
    out = jax.block_until_ready(fwd(x1, x2, params))

    assert out.shape == (B, N_OUT)
    assert bool(jnp.all(jnp.isfinite(out)))
    # softmax rows sum to ~1
    assert jnp.allclose(jnp.sum(out, axis=1), 1.0, atol=1e-4)
    print("KERNEL_OK")
</pallas_src>

<mosaic_0001>
module attributes {stable_mosaic.version = 11 : i64} {
  func.func @_frontend_kernel(%arg0: i32, %arg1: memref<8x16xf32, #tpu.memory_space<vmem>>, %arg2: memref<8x192xf32, #tpu.memory_space<vmem>>, %arg3: memref<16x200xf32, #tpu.memory_space<vmem>>, %arg4: memref<1x200xf32, #tpu.memory_space<vmem>>, %arg5: memref<200x100xf32, #tpu.memory_space<vmem>>, %arg6: memref<1x100xf32, #tpu.memory_space<vmem>>, %arg7: memref<192x484xf32, #tpu.memory_space<vmem>>, %arg8: memref<1x484xf32, #tpu.memory_space<vmem>>, %arg9: memref<484x220xf32, #tpu.memory_space<vmem>>, %arg10: memref<1x220xf32, #tpu.memory_space<vmem>>, %arg11: memref<100x480xf32, #tpu.memory_space<vmem>>, %arg12: memref<220x480xf32, #tpu.memory_space<vmem>>, %arg13: memref<1x480xf32, #tpu.memory_space<vmem>>, %arg14: memref<8x480xf32, #tpu.memory_space<vmem>>) attributes {dimension_semantics = [#tpu.dimension_semantics<parallel>], iteration_bounds = array<i64: 1>, scalar_prefetch = 0 : i64, scratch_operands = 0 : i64, tpu.core_type = #tpu.core_type<tc>, window_params = [{transform_indices = @transform_0, window_bounds = array<i64: 8, 16>}, {transform_indices = @transform_1, window_bounds = array<i64: 8, 192>}, {pipeline_mode = #tpu.pipeline_mode<synchronous>, transform_indices = @transform_2, window_bounds = array<i64: 16, 200>}, {pipeline_mode = #tpu.pipeline_mode<synchronous>, transform_indices = @transform_3, window_bounds = array<i64: 1, 200>}, {pipeline_mode = #tpu.pipeline_mode<synchronous>, transform_indices = @transform_4, window_bounds = array<i64: 200, 100>}, {pipeline_mode = #tpu.pipeline_mode<synchronous>, transform_indices = @transform_5, window_bounds = array<i64: 1, 100>}, {pipeline_mode = #tpu.pipeline_mode<synchronous>, transform_indices = @transform_6, window_bounds = array<i64: 192, 484>}, {pipeline_mode = #tpu.pipeline_mode<synchronous>, transform_indices = @transform_7, window_bounds = array<i64: 1, 484>}, {pipeline_mode = #tpu.pipeline_mode<synchronous>, transform_indices = @transform_8, window_bounds = array<i64: 484, 220>}, {pipeline_mode = #tpu.pipeline_mode<synchronous>, transform_indices = @transform_9, window_bounds = array<i64: 1, 220>}, {pipeline_mode = #tpu.pipeline_mode<synchronous>, transform_indices = @transform_10, window_bounds = array<i64: 100, 480>}, {pipeline_mode = #tpu.pipeline_mode<synchronous>, transform_indices = @transform_11, window_bounds = array<i64: 220, 480>}, {pipeline_mode = #tpu.pipeline_mode<synchronous>, transform_indices = @transform_12, window_bounds = array<i64: 1, 480>}, {transform_indices = @transform_13, window_bounds = array<i64: 8, 480>}]} {
    %c0 = arith.constant 0 : index
    %c0_0 = arith.constant 0 : index
    %0 = vector.load %arg1[%c0, %c0_0] : memref<8x16xf32, #tpu.memory_space<vmem>>, vector<8x16xf32>
    %c0_1 = arith.constant 0 : index
    %c0_2 = arith.constant 0 : index
    %1 = vector.load %arg3[%c0_1, %c0_2] : memref<16x200xf32, #tpu.memory_space<vmem>>, vector<16x200xf32>
    %cst = arith.constant dense<0.000000e+00> : vector<8x200xf32>
    %2 = tpu.matmul %0, %1, %cst {dimension_numbers = #tpu.dot_dimension_numbers<[1], [0], [0], [1], [0, 0, 1, 1], [], []>} : vector<8x16xf32>, vector<16x200xf32>, vector<8x200xf32> -> vector<8x200xf32>
    %c0_3 = arith.constant 0 : index
    %c0_4 = arith.constant 0 : index
    %3 = vector.load %arg4[%c0_3, %c0_4] : memref<1x200xf32, #tpu.memory_space<vmem>>, vector<1x200xf32>
    %4 = vector.broadcast %3 : vector<1x200xf32> to vector<8x200xf32>
    %5 = arith.addf %2, %4 : vector<8x200xf32>
    %cst_5 = arith.constant 0.000000e+00 : f32
    %6 = vector.broadcast %cst_5 : f32 to vector<8x200xf32>
    %7 = arith.maximumf %5, %6 : vector<8x200xf32>
    %c0_6 = arith.constant 0 : index
    %c0_7 = arith.constant 0 : index
    %8 = vector.load %arg5[%c0_6, %c0_7] : memref<200x100xf32, #tpu.memory_space<vmem>>, vector<200x100xf32>
    %cst_8 = arith.constant dense<0.000000e+00> : vector<8x100xf32>
    %9 = tpu.matmul %7, %8, %cst_8 {dimension_numbers = #tpu.dot_dimension_numbers<[1], [0], [0], [1], [0, 0, 1, 1], [], []>} : vector<8x200xf32>, vector<200x100xf32>, vector<8x100xf32> -> vector<8x100xf32>
    %c0_9 = arith.constant 0 : index
    %c0_10 = arith.constant 0 : index
    %10 = vector.load %arg6[%c0_9, %c0_10] : memref<1x100xf32, #tpu.memory_space<vmem>>, vector<1x100xf32>
    %11 = vector.broadcast %10 : vector<1x100xf32> to vector<8x100xf32>
    %12 = arith.addf %9, %11 : vector<8x100xf32>
    %cst_11 = arith.constant 0.000000e+00 : f32
    %13 = vector.broadcast %cst_11 : f32 to vector<8x100xf32>
    %14 = arith.maximumf %12, %13 : vector<8x100xf32>
    %c0_12 = arith.constant 0 : index
    %c0_13 = arith.constant 0 : index
    %15 = vector.load %arg2[%c0_12, %c0_13] : memref<8x192xf32, #tpu.memory_space<vmem>>, vector<8x192xf32>
    %c0_14 = arith.constant 0 : index
    %c0_15 = arith.constant 0 : index
    %16 = vector.load %arg7[%c0_14, %c0_15] : memref<192x484xf32, #tpu.memory_space<vmem>>, vector<192x484xf32>
    %cst_16 = arith.constant dense<0.000000e+00> : vector<8x484xf32>
    %17 = tpu.matmul %15, %16, %cst_16 {dimension_numbers = #tpu.dot_dimension_numbers<[1], [0], [0], [1], [0, 0, 1, 1], [], []>} : vector<8x192xf32>, vector<192x484xf32>, vector<8x484xf32> -> vector<8x484xf32>
    %c0_17 = arith.constant 0 : index
    %c0_18 = arith.constant 0 : index
    %18 = vector.load %arg8[%c0_17, %c0_18] : memref<1x484xf32, #tpu.memory_space<vmem>>, vector<1x484xf32>
    %19 = vector.broadcast %18 : vector<1x484xf32> to vector<8x484xf32>
    %20 = arith.addf %17, %19 : vector<8x484xf32>
    %cst_19 = arith.constant 0.000000e+00 : f32
    %21 = vector.broadcast %cst_19 : f32 to vector<8x484xf32>
    %22 = arith.maximumf %20, %21 : vector<8x484xf32>
    %c0_20 = arith.constant 0 : index
    %c0_21 = arith.constant 0 : index
    %23 = vector.load %arg9[%c0_20, %c0_21] : memref<484x220xf32, #tpu.memory_space<vmem>>, vector<484x220xf32>
    %cst_22 = arith.constant dense<0.000000e+00> : vector<8x220xf32>
    %24 = tpu.matmul %22, %23, %cst_22 {dimension_numbers = #tpu.dot_dimension_numbers<[1], [0], [0], [1], [0, 0, 1, 1], [], []>} : vector<8x484xf32>, vector<484x220xf32>, vector<8x220xf32> -> vector<8x220xf32>
    %c0_23 = arith.constant 0 : index
    %c0_24 = arith.constant 0 : index
    %25 = vector.load %arg10[%c0_23, %c0_24] : memref<1x220xf32, #tpu.memory_space<vmem>>, vector<1x220xf32>
    %26 = vector.broadcast %25 : vector<1x220xf32> to vector<8x220xf32>
    %27 = arith.addf %24, %26 : vector<8x220xf32>
    %cst_25 = arith.constant 0.000000e+00 : f32
    %28 = vector.broadcast %cst_25 : f32 to vector<8x220xf32>
    %29 = arith.maximumf %27, %28 : vector<8x220xf32>
    %c0_26 = arith.constant 0 : index
    %c0_27 = arith.constant 0 : index
    %30 = vector.load %arg11[%c0_26, %c0_27] : memref<100x480xf32, #tpu.memory_space<vmem>>, vector<100x480xf32>
    %cst_28 = arith.constant dense<0.000000e+00> : vector<8x480xf32>
    %31 = tpu.matmul %14, %30, %cst_28 {dimension_numbers = #tpu.dot_dimension_numbers<[1], [0], [0], [1], [0, 0, 1, 1], [], []>} : vector<8x100xf32>, vector<100x480xf32>, vector<8x480xf32> -> vector<8x480xf32>
    %c0_29 = arith.constant 0 : index
    %c0_30 = arith.constant 0 : index
    %32 = vector.load %arg12[%c0_29, %c0_30] : memref<220x480xf32, #tpu.memory_space<vmem>>, vector<220x480xf32>
    %cst_31 = arith.constant dense<0.000000e+00> : vector<8x480xf32>
    %33 = tpu.matmul %29, %32, %cst_31 {dimension_numbers = #tpu.dot_dimension_numbers<[1], [0], [0], [1], [0, 0, 1, 1], [], []>} : vector<8x220xf32>, vector<220x480xf32>, vector<8x480xf32> -> vector<8x480xf32>
    %34 = arith.addf %31, %33 : vector<8x480xf32>
    %c0_32 = arith.constant 0 : index
    %c0_33 = arith.constant 0 : index
    %35 = vector.load %arg13[%c0_32, %c0_33] : memref<1x480xf32, #tpu.memory_space<vmem>>, vector<1x480xf32>
    %36 = vector.broadcast %35 : vector<1x480xf32> to vector<8x480xf32>
    %37 = arith.addf %34, %36 : vector<8x480xf32>
    %c0_34 = arith.constant 0 : index
    %c0_35 = arith.constant 0 : index
    %38 = vector.load %arg14[%c0_34, %c0_35] : memref<8x480xf32, #tpu.memory_space<vmem>>, vector<8x480xf32>
    tpu.vector_store %arg14[%c0_34, %c0_35], %37 {strides = array<i32>} : memref<8x480xf32, #tpu.memory_space<vmem>>, vector<8x480xf32>,
    return
  }
  func.func @transform_0(%arg0: i32) -> (i32, i32) {
    %c0_i32 = arith.constant 0 : i32
    %c0_i32_0 = arith.constant 0 : i32
    return %arg0, %c0_i32 : i32, i32
  }
  func.func @transform_1(%arg0: i32) -> (i32, i32) {
    %c0_i32 = arith.constant 0 : i32
    %c0_i32_0 = arith.constant 0 : i32
    return %arg0, %c0_i32 : i32, i32
  }
  func.func @transform_2(%arg0: i32) -> (i32, i32) {
    %c0_i32 = arith.constant 0 : i32
    %c0_i32_0 = arith.constant 0 : i32
    %c0_i32_1 = arith.constant 0 : i32
    return %c0_i32, %c0_i32_0 : i32, i32
  }
  func.func @transform_3(%arg0: i32) -> (i32, i32) {
    %c0_i32 = arith.constant 0 : i32
    %c0_i32_0 = arith.constant 0 : i32
    %c0_i32_1 = arith.constant 0 : i32
    return %c0_i32, %c0_i32_0 : i32, i32
  }
  func.func @transform_4(%arg0: i32) -> (i32, i32) {
    %c0_i32 = arith.constant 0 : i32
    %c0_i32_0 = arith.constant 0 : i32
    %c0_i32_1 = arith.constant 0 : i32
    return %c0_i32, %c0_i32_0 : i32, i32
  }
  func.func @transform_5(%arg0: i32) -> (i32, i32) {
    %c0_i32 = arith.constant 0 : i32
    %c0_i32_0 = arith.constant 0 : i32
    %c0_i32_1 = arith.constant 0 : i32
    return %c0_i32, %c0_i32_0 : i32, i32
  }
  func.func @transform_6(%arg0: i32) -> (i32, i32) {
    %c0_i32 = arith.constant 0 : i32
    %c0_i32_0 = arith.constant 0 : i32
    %c0_i32_1 = arith.constant 0 : i32
    return %c0_i32, %c0_i32_0 : i32, i32
  }
  func.func @transform_7(%arg0: i32) -> (i32, i32) {
    %c0_i32 = arith.constant 0 : i32
    %c0_i32_0 = arith.constant 0 : i32
    %c0_i32_1 = arith.constant 0 : i32
    return %c0_i32, %c0_i32_0 : i32, i32
  }
  func.func @transform_8(%arg0: i32) -> (i32, i32) {
    %c0_i32 = arith.constant 0 : i32
    %c0_i32_0 = arith.constant 0 : i32
    %c0_i32_1 = arith.constant 0 : i32
    return %c0_i32, %c0_i32_0 : i32, i32
  }
  func.func @transform_9(%arg0: i32) -> (i32, i32) {
    %c0_i32 = arith.constant 0 : i32
    %c0_i32_0 = arith.constant 0 : i32
    %c0_i32_1 = arith.constant 0 : i32
    return %c0_i32, %c0_i32_0 : i32, i32
  }
  func.func @transform_10(%arg0: i32) -> (i32, i32) {
    %c0_i32 = arith.constant 0 : i32
    %c0_i32_0 = arith.constant 0 : i32
    %c0_i32_1 = arith.constant 0 : i32
    return %c0_i32, %c0_i32_0 : i32, i32
  }
  func.func @transform_11(%arg0: i32) -> (i32, i32) {
    %c0_i32 = arith.constant 0 : i32
    %c0_i32_0 = arith.constant 0 : i32
    %c0_i32_1 = arith.constant 0 : i32
    return %c0_i32, %c0_i32_0 : i32, i32
  }
  func.func @transform_12(%arg0: i32) -> (i32, i32) {
    %c0_i32 = arith.constant 0 : i32
    %c0_i32_0 = arith.constant 0 : i32
    %c0_i32_1 = arith.constant 0 : i32
    return %c0_i32, %c0_i32_0 : i32, i32
  }
  func.func @transform_13(%arg0: i32) -> (i32, i32) {
    %c0_i32 = arith.constant 0 : i32
    %c0_i32_0 = arith.constant 0 : i32
    return %arg0, %c0_i32 : i32, i32
  }
}

module attributes {stable_mosaic.version = 11 : i64} {
  func.func @_bn_relu_linear_kernel(%arg0: i32, %arg1: memref<8x480xf32, #tpu.memory_space<vmem>>, %arg2: memref<1x480xf32, #tpu.memory_space<vmem>>, %arg3: memref<1x480xf32, #tpu.memory_space<vmem>>, %arg4: memref<480x240xf32, #tpu.memory_space<vmem>>, %arg5: memref<1x240xf32, #tpu.memory_space<vmem>>, %arg6: memref<8x240xf32, #tpu.memory_space<vmem>>) attributes {dimension_semantics = [#tpu.dimension_semantics<parallel>], iteration_bounds = array<i64: 1>, scalar_prefetch = 0 : i64, scratch_operands = 0 : i64, tpu.core_type = #tpu.core_type<tc>, window_params = [{transform_indices = @transform_0, window_bounds = array<i64: 8, 480>}, {pipeline_mode = #tpu.pipeline_mode<synchronous>, transform_indices = @transform_1, window_bounds = array<i64: 1, 480>}, {pipeline_mode = #tpu.pipeline_mode<synchronous>, transform_indices = @transform_2, window_bounds = array<i64: 1, 480>}, {pipeline_mode = #tpu.pipeline_mode<synchronous>, transform_indices = @transform_3, window_bounds = array<i64: 480, 240>}, {pipeline_mode = #tpu.pipeline_mode<synchronous>, transform_indices = @transform_4, window_bounds = array<i64: 1, 240>}, {transform_indices = @transform_5, window_bounds = array<i64: 8, 240>}]} {
    %c0 = arith.constant 0 : index
    %c0_0 = arith.constant 0 : index
    %0 = vector.load %arg1[%c0, %c0_0] : memref<8x480xf32, #tpu.memory_space<vmem>>, vector<8x480xf32>
    %c0_1 = arith.constant 0 : index
    %c0_2 = arith.constant 0 : index
    %1 = vector.load %arg2[%c0_1, %c0_2] : memref<1x480xf32, #tpu.memory_space<vmem>>, vector<1x480xf32>
    %2 = vector.broadcast %1 : vector<1x480xf32> to vector<8x480xf32>
    %3 = arith.mulf %0, %2 : vector<8x480xf32>
    %c0_3 = arith.constant 0 : index
    %c0_4 = arith.constant 0 : index
    %4 = vector.load %arg3[%c0_3, %c0_4] : memref<1x480xf32, #tpu.memory_space<vmem>>, vector<1x480xf32>
    %5 = vector.broadcast %4 : vector<1x480xf32> to vector<8x480xf32>
    %6 = arith.addf %3, %5 : vector<8x480xf32>
    %cst = arith.constant 0.000000e+00 : f32
    %7 = vector.broadcast %cst : f32 to vector<8x480xf32>
    %8 = arith.maximumf %6, %7 : vector<8x480xf32>
    %c0_5 = arith.constant 0 : index
    %c0_6 = arith.constant 0 : index
    %9 = vector.load %arg4[%c0_5, %c0_6] : memref<480x240xf32, #tpu.memory_space<vmem>>, vector<480x240xf32>
    %cst_7 = arith.constant dense<0.000000e+00> : vector<8x240xf32>
    %10 = tpu.matmul %8, %9, %cst_7 {dimension_numbers = #tpu.dot_dimension_numbers<[1], [0], [0], [1], [0, 0, 1, 1], [], []>} : vector<8x480xf32>, vector<480x240xf32>, vector<8x240xf32> -> vector<8x240xf32>
    %c0_8 = arith.constant 0 : index
    %c0_9 = arith.constant 0 : index
    %11 = vector.load %arg5[%c0_8, %c0_9] : memref<1x240xf32, #tpu.memory_space<vmem>>, vector<1x240xf32>
    %12 = vector.broadcast %11 : vector<1x240xf32> to vector<8x240xf32>
    %13 = arith.addf %10, %12 : vector<8x240xf32>
    %c0_10 = arith.constant 0 : index
    %c0_11 = arith.constant 0 : index
    %14 = vector.load %arg6[%c0_10, %c0_11] : memref<8x240xf32, #tpu.memory_space<vmem>>, vector<8x240xf32>
    tpu.vector_store %arg6[%c0_10, %c0_11], %13 {strides = array<i32>} : memref<8x240xf32, #tpu.memory_space<vmem>>, vector<8x240xf32>,
    return
  }
  func.func @transform_0(%arg0: i32) -> (i32, i32) {
    %c0_i32 = arith.constant 0 : i32
    %c0_i32_0 = arith.constant 0 : i32
    return %arg0, %c0_i32 : i32, i32
  }
  func.func @transform_1(%arg0: i32) -> (i32, i32) {
    %c0_i32 = arith.constant 0 : i32
    %c0_i32_0 = arith.constant 0 : i32
    %c0_i32_1 = arith.constant 0 : i32
    return %c0_i32, %c0_i32_0 : i32, i32
  }
  func.func @transform_2(%arg0: i32) -> (i32, i32) {
    %c0_i32 = arith.constant 0 : i32
    %c0_i32_0 = arith.constant 0 : i32
    %c0_i32_1 = arith.constant 0 : i32
    return %c0_i32, %c0_i32_0 : i32, i32
  }
  func.func @transform_3(%arg0: i32) -> (i32, i32) {
    %c0_i32 = arith.constant 0 : i32
    %c0_i32_0 = arith.constant 0 : i32
    %c0_i32_1 = arith.constant 0 : i32
    return %c0_i32, %c0_i32_0 : i32, i32
  }
  func.func @transform_4(%arg0: i32) -> (i32, i32) {
    %c0_i32 = arith.constant 0 : i32
    %c0_i32_0 = arith.constant 0 : i32
    %c0_i32_1 = arith.constant 0 : i32
    return %c0_i32, %c0_i32_0 : i32, i32
  }
  func.func @transform_5(%arg0: i32) -> (i32, i32) {
    %c0_i32 = arith.constant 0 : i32
    %c0_i32_0 = arith.constant 0 : i32
    return %arg0, %c0_i32 : i32, i32
  }
}

module attributes {stable_mosaic.version = 11 : i64} {
  func.func @_bn_relu_linear_softmax_kernel(%arg0: i32, %arg1: memref<8x240xf32, #tpu.memory_space<vmem>>, %arg2: memref<1x240xf32, #tpu.memory_space<vmem>>, %arg3: memref<1x240xf32, #tpu.memory_space<vmem>>, %arg4: memref<240x256xf32, #tpu.memory_space<vmem>>, %arg5: memref<1x256xf32, #tpu.memory_space<vmem>>, %arg6: memref<8x256xf32, #tpu.memory_space<vmem>>) attributes {dimension_semantics = [#tpu.dimension_semantics<parallel>], iteration_bounds = array<i64: 1>, scalar_prefetch = 0 : i64, scratch_operands = 0 : i64, tpu.core_type = #tpu.core_type<tc>, window_params = [{transform_indices = @transform_0, window_bounds = array<i64: 8, 240>}, {pipeline_mode = #tpu.pipeline_mode<synchronous>, transform_indices = @transform_1, window_bounds = array<i64: 1, 240>}, {pipeline_mode = #tpu.pipeline_mode<synchronous>, transform_indices = @transform_2, window_bounds = array<i64: 1, 240>}, {pipeline_mode = #tpu.pipeline_mode<synchronous>, transform_indices = @transform_3, window_bounds = array<i64: 240, 256>}, {pipeline_mode = #tpu.pipeline_mode<synchronous>, transform_indices = @transform_4, window_bounds = array<i64: 1, 256>}, {transform_indices = @transform_5, window_bounds = array<i64: 8, 256>}]} {
    %c0 = arith.constant 0 : index
    %c0_0 = arith.constant 0 : index
    %0 = vector.load %arg1[%c0, %c0_0] : memref<8x240xf32, #tpu.memory_space<vmem>>, vector<8x240xf32>
    %c0_1 = arith.constant 0 : index
    %c0_2 = arith.constant 0 : index
    %1 = vector.load %arg2[%c0_1, %c0_2] : memref<1x240xf32, #tpu.memory_space<vmem>>, vector<1x240xf32>
    %2 = vector.broadcast %1 : vector<1x240xf32> to vector<8x240xf32>
    %3 = arith.mulf %0, %2 : vector<8x240xf32>
    %c0_3 = arith.constant 0 : index
    %c0_4 = arith.constant 0 : index
    %4 = vector.load %arg3[%c0_3, %c0_4] : memref<1x240xf32, #tpu.memory_space<vmem>>, vector<1x240xf32>
    %5 = vector.broadcast %4 : vector<1x240xf32> to vector<8x240xf32>
    %6 = arith.addf %3, %5 : vector<8x240xf32>
    %cst = arith.constant 0.000000e+00 : f32
    %7 = vector.broadcast %cst : f32 to vector<8x240xf32>
    %8 = arith.maximumf %6, %7 : vector<8x240xf32>
    %c0_5 = arith.constant 0 : index
    %c0_6 = arith.constant 0 : index
    %9 = vector.load %arg4[%c0_5, %c0_6] : memref<240x256xf32, #tpu.memory_space<vmem>>, vector<240x256xf32>
    %cst_7 = arith.constant dense<0.000000e+00> : vector<8x256xf32>
    %10 = tpu.matmul %8, %9, %cst_7 {dimension_numbers = #tpu.dot_dimension_numbers<[1], [0], [0], [1], [0, 0, 1, 1], [], []>} : vector<8x240xf32>, vector<240x256xf32>, vector<8x256xf32> -> vector<8x256xf32>
    %c0_8 = arith.constant 0 : index
    %c0_9 = arith.constant 0 : index
    %11 = vector.load %arg5[%c0_8, %c0_9] : memref<1x256xf32, #tpu.memory_space<vmem>>, vector<1x256xf32>
    %12 = vector.broadcast %11 : vector<1x256xf32> to vector<8x256xf32>
    %13 = arith.addf %10, %12 : vector<8x256xf32>
    %cst_10 = arith.constant dense<0xFF800000> : vector<8xf32>
    %14 = vector.multi_reduction <maximumf>, %13, %cst_10 [1] : vector<8x256xf32> to vector<8xf32>
    %15 = vector.shape_cast %14 : vector<8xf32> to vector<8x1xf32>
    %16 = vector.broadcast %15 : vector<8x1xf32> to vector<8x256xf32>
    %17 = arith.subf %13, %16 : vector<8x256xf32>
    %18 = math.exp %17 : vector<8x256xf32>
    %cst_11 = arith.constant dense<0.000000e+00> : vector<8xf32>
    %19 = vector.multi_reduction <add>, %18, %cst_11 [1] : vector<8x256xf32> to vector<8xf32>
    %20 = vector.shape_cast %19 : vector<8xf32> to vector<8x1xf32>
    %21 = vector.broadcast %20 : vector<8x1xf32> to vector<8x256xf32>
    %22 = arith.divf %18, %21 : vector<8x256xf32>
    %c0_12 = arith.constant 0 : index
    %c0_13 = arith.constant 0 : index
    %23 = vector.load %arg6[%c0_12, %c0_13] : memref<8x256xf32, #tpu.memory_space<vmem>>, vector<8x256xf32>
    tpu.vector_store %arg6[%c0_12, %c0_13], %22 {strides = array<i32>} : memref<8x256xf32, #tpu.memory_space<vmem>>, vector<8x256xf32>,
    return
  }
  func.func @transform_0(%arg0: i32) -> (i32, i32) {
    %c0_i32 = arith.constant 0 : i32
    %c0_i32_0 = arith.constant 0 : i32
    return %arg0, %c0_i32 : i32, i32
  }
  func.func @transform_1(%arg0: i32) -> (i32, i32) {
    %c0_i32 = arith.constant 0 : i32
    %c0_i32_0 = arith.constant 0 : i32
    %c0_i32_1 = arith.constant 0 : i32
    return %c0_i32, %c0_i32_0 : i32, i32
  }
  func.func @transform_2(%arg0: i32) -> (i32, i32) {
    %c0_i32 = arith.constant 0 : i32
    %c0_i32_0 = arith.constant 0 : i32
    %c0_i32_1 = arith.constant 0 : i32
    return %c0_i32, %c0_i32_0 : i32, i32
  }
  func.func @transform_3(%arg0: i32) -> (i32, i32) {
    %c0_i32 = arith.constant 0 : i32
    %c0_i32_0 = arith.constant 0 : i32
    %c0_i32_1 = arith.constant 0 : i32
    return %c0_i32, %c0_i32_0 : i32, i32
  }
  func.func @transform_4(%arg0: i32) -> (i32, i32) {
    %c0_i32 = arith.constant 0 : i32
    %c0_i32_0 = arith.constant 0 : i32
    %c0_i32_1 = arith.constant 0 : i32
    return %c0_i32, %c0_i32_0 : i32, i32
  }
  func.func @transform_5(%arg0: i32) -> (i32, i32) {
    %c0_i32 = arith.constant 0 : i32
    %c0_i32_0 = arith.constant 0 : i32
    return %arg0, %c0_i32 : i32, i32
  }
}

</mosaic_0001>

<bundles_post_ra>
// kernel: mixture_nn_forward.4
= control target key start
LH: loop header
LB: loop body
LE: loop exit
PB: predicated region body
PF: predicated region fallthrough
CT: control target
= control target key end

     0   :  { %vm212_vm0 = vcmask 785408   ;;  %vm359_vm1 = vcmask 916480   ;;  %s811_s3 = inlined_call_operand.vmem [shape: f32[480,240], index: 3, kind: input, shape index: {}]   ;;  %s812_s1 = inlined_call_operand.vmem [shape: f32[1,480], index: 1, kind: input, shape index: {}]   ;;  %s813_s0 = inlined_call_operand.vmem [shape: f32[8,480], index: 0, kind: input, shape index: {}]   ;;  %s814_s2 = inlined_call_operand.vmem [shape: f32[1,480], index: 2, kind: input, shape index: {}]   ;;  %s815_s4 = inlined_call_operand.vmem [shape: f32[1,240], index: 4, kind: input, shape index: {}]   ;;  %s816_s5 = inlined_call_operand.vmem [shape: f32[8,240], index: 5, kind: output, shape index: {}]  }
   0x1   :  { %v111_v0 = vld [vmem:[%s811_s3 + $0xf8] sm:$0xff]  ;;  %v110_v1 = vld [vmem:[%s811_s3 + $0xf0] sm:$0xff]  ;;  %v109_v2 = vld [vmem:[%s811_s3 + $0xe8] sm:$0xff] }
   0x2   :  { %216 = vmatprep.subr.mxu0 %v111_v0  ;;  %v108_v3 = vld [vmem:[%s811_s3 + $0xe0] sm:$0xff]  ;;  %v107_v4 = vld [vmem:[%s811_s3 + $0xd8] sm:$0xff]  ;;  %v106_v5 = vld [vmem:[%s811_s3 + $0xd0] sm:$0xff] }
   0x3   :  { %217 = vmatpush1.msra.mxu0 %v110_v1  ;;  %v175_v6 = vld [vmem:[%s811_s3 + $0x2f8] sm:$0xff]  ;;  %v174_v7 = vld [vmem:[%s811_s3 + $0x2f0] sm:$0xff]  ;;  %v105_v8 = vld [vmem:[%s811_s3 + $0xc8] sm:$0xff]  ;;  %v26_v1 = vlaneseq }
   0x4   :  { %218 = vmatprep.subr.mxu0 %v109_v2  ;;  %287 = vmatprep.subr.mxu1 %v175_v6  ;;  %v173_v9 = vld [vmem:[%s811_s3 + $0x2e8] sm:$0xff]  ;;  %v104_v10 = vld [vmem:[%s811_s3 + $0xc0] sm:$0xff]  ;;  %v171_v12 = vld [vmem:[%s811_s3 + $0x2d8] sm:$0xff] }
   0x5   :  { %219 = vmatpush1.msra.mxu0 %v108_v3  ;;  %288 = vmatpush1.msra.mxu1 %v174_v7  ;;  %v172_v11 = vld [vmem:[%s811_s3 + $0x2e0] sm:$0xff]  ;;  %v103_v13 = vld [vmem:[%s811_s3 + $0xb8] sm:$0xff]  ;;  %v170_v14 = vld [vmem:[%s811_s3 + $0x2d0] sm:$0xff] }
   0x6   :  { %220 = vmatprep.subr.mxu0 %v107_v4  ;;  %289 = vmatprep.subr.mxu1 %v173_v9  ;;  %v102_v15 = vld [vmem:[%s811_s3 + $0xb0] sm:$0xff]  ;;  %v169_v16 = vld [vmem:[%s811_s3 + $0x2c8] sm:$0xff]  ;;  %v168_v18 = vld [vmem:[%s811_s3 + $0x2c0] sm:$0xff] }
   0x7   :  { %221 = vmatpush1.msra.mxu0 %v106_v5  ;;  %290 = vmatpush1.msra.mxu1 %v172_v11  ;;  %v101_v17 = vld [vmem:[%s811_s3 + $0xa8] sm:$0xff]  ;;  %v100_v19 = vld [vmem:[%s811_s3 + $0xa0] sm:$0xff]  ;;  %v167_v20 = vld [vmem:[%s811_s3 + $0x2b8] sm:$0xff] }
   0x8   :  { %222 = vmatprep.subr.mxu0 %v105_v8  ;;  %291 = vmatprep.subr.mxu1 %v171_v12  ;;  %v99_v21 = vld [vmem:[%s811_s3 + $0x98] sm:$0xff]  ;;  %v166_v22 = vld [vmem:[%s811_s3 + $0x2b0] sm:$0xff]  ;;  %v165_v24 = vld [vmem:[%s811_s3 + $0x2a8] sm:$0xff] }
   0x9   :  { %223 = vmatpush1.msra.mxu0 %v104_v10  ;;  %292 = vmatpush1.msra.mxu1 %v170_v14  ;;  %v98_v23 = vld [vmem:[%s811_s3 + $0x90] sm:$0xff]  ;;  %v97_v25 = vld [vmem:[%s811_s3 + $0x88] sm:$0xff]  ;;  %v164_v26 = vld [vmem:[%s811_s3 + $0x2a0] sm:$0xff]  ;;  %v615_v10 = vshrl.u32 %v26_v1, 7 }
   0xa   :  { %224 = vmatprep.subr.mxu0 %v103_v13  ;;  %293 = vmatprep.subr.mxu1 %v169_v16  ;;  %v96_v27 = vld [vmem:[%s811_s3 + $0x80] sm:$0xff]  ;;  %v163_v28 = vld [vmem:[%s811_s3 + $0x298] sm:$0xff]  ;;  %v162_v30 = vld [vmem:[%s811_s3 + $0x290] sm:$0xff] }
   0xb   :  { %225 = vmatpush1.msra.mxu0 %v102_v15  ;;  %294 = vmatpush1.msra.mxu1 %v168_v18  ;;  %v95_v29 = vld [vmem:[%s811_s3 + $0x78] sm:$0xff]  ;;  %v94_v31 = vld [vmem:[%s811_s3 + $0x70] sm:$0xff]  ;;  %v161_v32 = vld [vmem:[%s811_s3 + $0x288] sm:$0xff] }
   0xc   :  { %226 = vmatprep.subr.mxu0 %v101_v17  ;;  %295 = vmatprep.subr.mxu1 %v167_v20  ;;  %v93_v33 = vld [vmem:[%s811_s3 + $0x68] sm:$0xff]  ;;  %v160_v34 = vld [vmem:[%s811_s3 + $0x280] sm:$0xff]  ;;  %v159_v36 = vld [vmem:[%s811_s3 + $0x278] sm:$0xff] }
   0xd   :  { %227 = vmatpush1.msra.mxu0 %v100_v19  ;;  %296 = vmatpush1.msra.mxu1 %v166_v22  ;;  %v92_v35 = vld [vmem:[%s811_s3 + $0x60] sm:$0xff]  ;;  %v91_v37 = vld [vmem:[%s811_s3 + $0x58] sm:$0xff]  ;;  %v158_v38 = vld [vmem:[%s811_s3 + $0x270] sm:$0xff]  ;;  %v642_v19 = vsub.s32 1, %v615_v10 }
   0xe   :  { %228 = vmatprep.subr.mxu0 %v99_v21  ;;  %297 = vmatprep.subr.mxu1 %v165_v24  ;;  %v90_v39 = vld [vmem:[%s811_s3 + $0x50] sm:$0xff]  ;;  %v157_v40 = vld [vmem:[%s811_s3 + $0x268] sm:$0xff]  ;;  %v156_v42 = vld [vmem:[%s811_s3 + $0x260] sm:$0xff] }
   0xf   :  { %229 = vmatpush1.msra.mxu0 %v98_v23  ;;  %298 = vmatpush1.msra.mxu1 %v164_v26  ;;  %v89_v41 = vld [vmem:[%s811_s3 + $0x48] sm:$0xff]  ;;  %v88_v43 = vld [vmem:[%s811_s3 + $0x40] sm:$0xff]  ;;  %v155_v44 = vld [vmem:[%s811_s3 + $0x258] sm:$0xff] }
  0x10   :  { %230 = vmatprep.subr.mxu0 %v97_v25  ;;  %299 = vmatprep.subr.mxu1 %v163_v28  ;;  %v87_v45 = vld [vmem:[%s811_s3 + $0x38] sm:$0xff]  ;;  %v154_v46 = vld [vmem:[%s811_s3 + $0x250] sm:$0xff]  ;;  %v153_v48 = vld [vmem:[%s811_s3 + $0x248] sm:$0xff]  ;;  %v40_v25 = vsub.s32 3, %v615_v10  ;;  %v36_v28 = vsub.s32 2, %v615_v10 }
  0x11   :  { %231 = vmatpush1.msra.mxu0 %v96_v27  ;;  %300 = vmatpush1.msra.mxu1 %v162_v30  ;;  %v86_v47 = vld [vmem:[%s811_s3 + $0x30] sm:$0xff]  ;;  %v85_v49 = vld [vmem:[%s811_s3 + $0x28] sm:$0xff]  ;;  %v152_v50 = vld [vmem:[%s811_s3 + $0x240] sm:$0xff] }
  0x12   :  { %232 = vmatprep.subr.mxu0 %v95_v29  ;;  %301 = vmatprep.subr.mxu1 %v161_v32  ;;  %v84_v51 = vld [vmem:[%s811_s3 + $0x20] sm:$0xff]  ;;  %v151_v52 = vld [vmem:[%s811_s3 + $0x238] sm:$0xff]  ;;  %v150_v54 = vld [vmem:[%s811_s3 + $0x230] sm:$0xff] }
  0x13   :  { %233 = vmatpush1.msra.mxu0 %v94_v31  ;;  %302 = vmatpush1.msra.mxu1 %v160_v34  ;;  %v83_v53 = vld [vmem:[%s811_s3 + $0x18] sm:$0xff]  ;;  %v82_v55 = vld [vmem:[%s811_s3 + $0x10] sm:$0xff]  ;;  %v149_v56 = vld [vmem:[%s811_s3 + $0x228] sm:$0xff] }
  0x14   :  { %234 = vmatprep.subr.mxu0 %v93_v33  ;;  %303 = vmatprep.subr.mxu1 %v159_v36  ;;  %v81_v57 = vld [vmem:[%s811_s3 + $0x8] sm:$0xff]  ;;  %v148_v58 = vld [vmem:[%s811_s3 + $0x220] sm:$0xff]  ;;  %v147_v60 = vld [vmem:[%s811_s3 + $0x218] sm:$0xff] }
  0x15   :  { %235 = vmatpush1.msra.mxu0 %v92_v35  ;;  %304 = vmatpush1.msra.mxu1 %v158_v38  ;;  %v80_v59 = vld [vmem:[%s811_s3] sm:$0xff]  ;;  %v143_v61 = vld [vmem:[%s811_s3 + $0x1f8] sm:$0xff]  ;;  %v146_v62 = vld [vmem:[%s811_s3 + $0x210] sm:$0xff] }
  0x16   :  { %236 = vmatprep.subr.mxu0 %v91_v37  ;;  %305 = vmatprep.subr.mxu1 %v157_v40  ;;  %v142_v63 = vld [vmem:[%s811_s3 + $0x1f0] sm:$0xff]  ;;  %v145_v0 = vld [vmem:[%s811_s3 + $0x208] sm:$0xff]  ;;  %v144_v3 = vld [vmem:[%s811_s3 + $0x200] sm:$0xff] }
  0x17   :  { %237 = vmatpush1.msra.mxu0 %v90_v39  ;;  %306 = vmatpush1.msra.mxu1 %v156_v42  ;;  %v141_v2 = vld [vmem:[%s811_s3 + $0x1e8] sm:$0xff]  ;;  %v140_v4 = vld [vmem:[%s811_s3 + $0x1e0] sm:$0xff]  ;;  %v199_v5 = vld [vmem:[%s811_s3 + $0x3b8] sm:$0xff]  ;;  %v699_v39 = vsub.s32 0, %v615_v10 }
  0x18   :  { %238 = vmatprep.subr.mxu0 %v89_v41  ;;  %307 = vmatprep.subr.mxu1 %v155_v44  ;;  %v139_v6 = vld [vmem:[%s811_s3 + $0x1d8] sm:$0xff]  ;;  %v198_v7 = vld [vmem:[%s811_s3 + $0x3b0] sm:$0xff]  ;;  %v197_v9 = vld [vmem:[%s811_s3 + $0x3a8] sm:$0xff] }
  0x19   :  { %239 = vmatpush1.msra.mxu0 %v88_v43  ;;  %308 = vmatpush1.msra.mxu1 %v154_v46  ;;  %v138_v8 = vld [vmem:[%s811_s3 + $0x1d0] sm:$0xff]  ;;  %v137_v11 = vld [vmem:[%s811_s3 + $0x1c8] sm:$0xff]  ;;  %v196_v12 = vld [vmem:[%s811_s3 + $0x3a0] sm:$0xff] }
  0x1a   :  { %240 = vmatprep.subr.mxu0 %v87_v45  ;;  %309 = vmatprep.subr.mxu1 %v153_v48  ;;  %v136_v13 = vld [vmem:[%s811_s3 + $0x1c0] sm:$0xff]  ;;  %v195_v14 = vld [vmem:[%s811_s3 + $0x398] sm:$0xff]  ;;  %v194_v16 = vld [vmem:[%s811_s3 + $0x390] sm:$0xff] }
  0x1b   :  { %241 = vmatpush1.msra.mxu0 %v86_v47  ;;  %310 = vmatpush1.msra.mxu1 %v152_v50  ;;  %v135_v15 = vld [vmem:[%s811_s3 + $0x1b8] sm:$0xff]  ;;  %v134_v17 = vld [vmem:[%s811_s3 + $0x1b0] sm:$0xff]  ;;  %v193_v18 = vld [vmem:[%s811_s3 + $0x388] sm:$0xff] }
  0x1c   :  { %242 = vmatprep.subr.mxu0 %v85_v49  ;;  %311 = vmatprep.subr.mxu1 %v151_v52  ;;  %v133_v20 = vld [vmem:[%s811_s3 + $0x1a8] sm:$0xff]  ;;  %v192_v21 = vld [vmem:[%s811_s3 + $0x380] sm:$0xff]  ;;  %v191_v24 = vld [vmem:[%s811_s3 + $0x378] sm:$0xff] }
  0x1d   :  { %243 = vmatpush1.msra.mxu0 %v84_v51  ;;  %312 = vmatpush1.msra.mxu1 %v150_v54  ;;  %v653_v22 = vld [vmem:[%s812_s1] sm:$0xf]  ;;  %v131_v26 = vld [vmem:[%s811_s3 + $0x198] sm:$0xff]  ;;  %v190_v27 = vld [vmem:[%s811_s3 + $0x370] sm:$0xff] }
  0x1e   :  { %244 = vmatprep.subr.mxu0 %v83_v53  ;;  %313 = vmatprep.subr.mxu1 %v149_v56  ;;  %v132_v23 = vld [vmem:[%s811_s3 + $0x1a0] sm:$0xff]  ;;  %v130_v29 = vld [vmem:[%s811_s3 + $0x190] sm:$0xff]  ;;  %v129_v30 = vld [vmem:[%s811_s3 + $0x188] sm:$0xff]  ;;  %v33_v32 = vrot.slane %v653_v22, %v642_v19  ;;  %v41_v38 = vrot.slane %v653_v22, %v40_v25  ;;  %v37_v43 = vrot.slane %v653_v22, %v36_v28 }
  0x1f   :  { %245 = vmatpush1.msra.mxu0 %v82_v55  ;;  %314 = vmatpush1.msra.mxu1 %v148_v58  ;;  %v189_v31 = vld [vmem:[%s811_s3 + $0x368] sm:$0xff]  ;;  %v188_v33 = vld [vmem:[%s811_s3 + $0x360] sm:$0xff]  ;;  %v187_v37 = vld [vmem:[%s811_s3 + $0x358] sm:$0xff]  ;;  %v29_v55 = vrot.slane %v653_v22, %v699_v39 }
  0x20   :  { %246 = vmatprep.subr.mxu0 %v81_v57  ;;  %315 = vmatprep.subr.mxu1 %v147_v60  ;;  %v21_v34 = vld [vmem:[%s813_s0 + $0x8] sm:$0xff]  ;;  %v689_v35 = vld [vmem:[%s814_s2] sm:$0xf]  ;;  %v127_v40 = vld [vmem:[%s811_s3 + $0x178] sm:$0xff] }
  0x21   :  { %247 = vmatpush1.msra.mxu0 %v80_v59  ;;  %316 = vmatpush1.msra.mxu1 %v146_v62  ;;  %v128_v36 = vld [vmem:[%s811_s3 + $0x180] sm:$0xff]  ;;  %v186_v41 = vld [vmem:[%s811_s3 + $0x350] sm:$0xff]  ;;  %v23_v42 = vld [vmem:[%s813_s0 + $0x18] sm:$0xff]  ;;  %v47_v46 = vmul.f32 %v33_v32, %v21_v34  ;;  %v59_v47 = vrot.slane %v689_v35, %v642_v19  ;;  %v67_v54 = vrot.slane %v689_v35, %v40_v25 }
  0x22   :  { %248 = vmatprep.subr.mxu0 %v143_v61  ;;  %317 = vmatprep.subr.mxu1 %v145_v0  ;;  %v126_v44 = vld [vmem:[%s811_s3 + $0x170] sm:$0xff]  ;;  %v185_v45 = vld [vmem:[%s811_s3 + $0x348] sm:$0xff]  ;;  %v184_v50 = vld [vmem:[%s811_s3 + $0x340] sm:$0xff]  ;;  %v49_v53 = vmul.f32 %v41_v38, %v23_v42  ;;  %v63_v60 = vrot.slane %v689_v35, %v36_v28 }
  0x23   :  { %249 = vmatpush2.msra.mxu0 %v142_v63  ;;  %318 = vmatpush1.msra.mxu1 %v144_v3  ;;  %v22_v48 = vld [vmem:[%s813_s0 + $0x10] sm:$0xff]  ;;  %v125_v49 = vld [vmem:[%s811_s3 + $0x168] sm:$0xff]  ;;  %v124_v51 = vld [vmem:[%s811_s3 + $0x160] sm:$0xff]  ;;  %v73_v63 = vadd.f32 %v59_v47, %v47_v46 }
  0x24   :  { %250 = vmatprep.subr.mxu0 %v141_v2  ;;  %327 = vmatprep.subr.mxu1 %v199_v5  ;;  %v183_v52 = vld [vmem:[%s811_s3 + $0x338] sm:$0xff]  ;;  %v182_v57 = vld [vmem:[%s811_s3 + $0x330] sm:$0xff]  ;;  %v20_v58 = vld [vmem:[%s813_s0] sm:$0xff]  ;;  %v48_v59 = vmul.f32 %v37_v43, %v22_v48 }
  0x25   :  { %251 = vmatpush2.msra.mxu0 %v140_v4  ;;  %328 = vmatpush2.msra.mxu1 %v198_v7  ;;  %v123_v56 = vld [vmem:[%s811_s3 + $0x158] sm:$0xff]  ;;  %v122_v61 = vld [vmem:[%s811_s3 + $0x150] sm:$0xff]  ;;  %v181_v62 = vld [vmem:[%s811_s3 + $0x328] sm:$0xff]  ;;  %v75_v4 = vadd.f32 %v67_v54, %v49_v53  ;;  %v46_v5 = vmul.f32 %v29_v55, %v20_v58 }
  0x26   :  { %252 = vmatprep.subr.mxu0 %v139_v6  ;;  %329 = vmatprep.subr.mxu1 %v197_v9  ;;  %v121_v0 = vld [vmem:[%s811_s3 + $0x148] sm:$0xff]  ;;  %v180_v1 = vld [vmem:[%s811_s3 + $0x320] sm:$0xff]  ;;  %v179_v3 = vld [vmem:[%s811_s3 + $0x318] sm:$0xff]  ;;  %v55_v6 = vrot.slane %v689_v35, %v699_v39  ;;  %v74_v9 = vadd.f32 %v63_v60, %v48_v59 }
  0x27   :  { %253 = vmatpush2.msra.mxu0 %v138_v8  ;;  %330 = vmatpush2.msra.mxu1 %v196_v12  ;;  %v120_v2 = vld [vmem:[%s811_s3 + $0x140] sm:$0xff]  ;;  %v119_v7 = vld [vmem:[%s811_s3 + $0x138] sm:$0xff]  ;;  %v178_v8 = vld [vmem:[%s811_s3 + $0x310] sm:$0xff]  ;;  %v77_v12 = vmax.f32 %v73_v63, 0.0 }
  0x28   :  { %254 = vmatprep.subr.mxu0 %v137_v11  ;;  %331 = vmatprep.subr.mxu1 %v195_v14  ;;  %v118_v10 = vld [vmem:[%s811_s3 + $0x130] sm:$0xff]  ;;  %v177_v11 = vld [vmem:[%s811_s3 + $0x308] sm:$0xff]  ;;  %v116_v14 = vld [vmem:[%s811_s3 + $0x120] sm:$0xff] }
  0x29   :  { %255 = vmatpush2.msra.mxu0 %v136_v13  ;;  %332 = vmatpush2.msra.mxu1 %v194_v16  ;;  %v117_v13 = vld [vmem:[%s811_s3 + $0x128] sm:$0xff]  ;;  %v79_v16 = vmax.f32 %v75_v4, 0.0  ;;  %v200_v25 = vld [vmem:[%s815_s4] sm:$0x3] }
  0x2a   :  { %256 = vmatprep.subr.mxu0 %v135_v15  ;;  %333 = vmatprep.subr.mxu1 %v193_v18  ;;  %v176_v15 = vld [vmem:[%s811_s3 + $0x300] sm:$0xff]  ;;  %v115_v18 = vld [vmem:[%s811_s3 + $0x118] sm:$0xff]  ;;  %v113_v22 = vld [vmem:[%s811_s3 + $0x108] sm:$0xff] }
  0x2b   :  { %257 = vmatpush2.msra.mxu0 %v134_v17  ;;  %334 = vmatpush2.msra.mxu1 %v192_v21  ;;  %v72_v17 = vadd.f32 %v55_v6, %v46_v5  ;;  %v114_v21 = vld [vmem:[%s811_s3 + $0x110] sm:$0xff] }
  0x2c   :  { %258 = vmatprep.subr.mxu0 %v133_v20  ;;  %335 = vmatprep.subr.mxu1 %v191_v24  ;;  %v78_v20 = vmax.f32 %v74_v9, 0.0 }
  0x2d   :  { %259 = vmatpush2.msra.mxu0 %v132_v23  ;;  %336 = vmatpush2.msra.mxu1 %v190_v27  ;;  %v112_v23 = vld [vmem:[%s811_s3 + $0x100] sm:$0xff]  ;;  %v76_v24 = vmax.f32 %v72_v17, 0.0  ;;  %v209_v27 = vrot.slane %v200_v25, %v642_v19 }
  0x2e   :  { %260 = vmatprep.subr.mxu0 %v131_v26  ;;  %337 = vmatprep.subr.mxu1 %v189_v31  ;;  %v205_v26 = vrot.slane %v200_v25, %v699_v39 }
  0x2f   :  { %261 = vmatpush2.msra.mxu0 %v130_v29  ;;  %338 = vmatpush2.msra.mxu1 %v188_v33 }
  0x30   :  { %262 = vmatprep.subr.mxu0 %v129_v30  ;;  %339 = vmatprep.subr.mxu1 %v187_v37 }
  0x31   :  { %263 = vmatpush2.msra.mxu0 %v128_v36  ;;  %340 = vmatpush2.msra.mxu1 %v186_v41 }
  0x32   :  { %264 = vmatprep.subr.mxu0 %v127_v40  ;;  %341 = vmatprep.subr.mxu1 %v185_v45 }
  0x33   :  { %265 = vmatpush2.msra.mxu0 %v126_v44  ;;  %342 = vmatpush2.msra.mxu1 %v184_v50 }
  0x34   :  { %266 = vmatprep.subr.mxu0 %v125_v49  ;;  %343 = vmatprep.subr.mxu1 %v183_v52 }
  0x35   :  { %267 = vmatpush2.msra.mxu0 %v124_v51  ;;  %344 = vmatpush2.msra.mxu1 %v182_v57 }
  0x36   :  { %268 = vmatprep.subr.mxu0 %v123_v56  ;;  %345 = vmatprep.subr.mxu1 %v181_v62 }
  0x37   :  { %269 = vmatpush2.msra.mxu0 %v122_v61  ;;  %346 = vmatpush2.msra.mxu1 %v180_v1 }
  0x38   :  { %270 = vmatprep.subr.mxu0 %v121_v0  ;;  %347 = vmatprep.subr.mxu1 %v179_v3 }
  0x39   :  { %271 = vmatpush2.msra.mxu0 %v120_v2  ;;  %348 = vmatpush2.msra.mxu1 %v178_v8 }
  0x3a   :  { %272 = vmatprep.subr.mxu0 %v119_v7  ;;  %349 = vmatprep.subr.mxu1 %v177_v11 }
  0x3b   :  { %273 = vmatpush2.msra.mxu0 %v118_v10  ;;  %280 = vmatprep.mubr.f32.mxu0 %v77_v12 }
  0x3c   :  { %274 = vmatprep.subr.mxu0 %v117_v13  ;;  %350 = vmatpush2.msra.mxu1 %v176_v15 }
  0x3d   :  { %275 = vmatpush2.msra.mxu0 %v116_v14  ;;  %365 = vmatprep.mubr.msk.f32.mxu1 %vm212_vm0, %v79_v16 }
  0x3e   :  { %276 = vmatprep.subr.mxu0 %v115_v18  ;;  %352 = vmatmul.mubr.f32.vlgmr.msra.gmra.mxu1 %v78_v20 }
  0x3f   :  { %277 = vmatpush2.msra.mxu0 %v114_v21 }
  0x40   :  { %278 = vmatprep.subr.mxu0 %v113_v22 }
  0x41   :  { %279 = vmatpush2.msra.mxu0 %v112_v23 }
  0x42   :  { %281 = vmatmul.mubr.f32.vlgmr.msra.gmra.mxu0 %v76_v24 }
  0xfe   :  { %v353_v29 = vpop.f32.mrf.mxu1 }
 0x100   :  { %v355_v34 = vpop.f32.mrf.mxu1 }
 0x102   :  { %v282_v28 = vpop.f32.mrf.mxu0 }
 0x103   :  { %v283_v30 = vadd.f32 %v282_v28, %v205_v26 }
 0x104   :  { %v284_v31 = vpop.f32.mrf.mxu0 }
 0x105   :  { %v354_v32 = vadd.f32 %v353_v29, %v283_v30  ;;  %v285_v33 = vadd.f32 %v284_v31, %v209_v27 }
 0x107   :  { %358 = vst [vmem:[%s816_s5] sm:$0xff] %v354_v32  ;;  %v356_v35 = vadd.f32 %v355_v34, %v285_v33 }
 0x109   :  { %360 = vst.msk [vmem:[%s816_s5 + $0x8] sm:$0xff] %vm359_vm1, %v356_v35 }

// kernel: mixture_nn_forward.5
= control target key start
LH: loop header
LB: loop body
LE: loop exit
PB: predicated region body
PF: predicated region fallthrough
CT: control target
= control target key end

     0   :  { %v24_v12 = vlaneseq  ;;  %vm124_vm0 = vcmask 916480   ;;  %s475_s3 = inlined_call_operand.vmem [shape: f32[240,256], index: 3, kind: input, shape index: {}]   ;;  %s476_s0 = inlined_call_operand.vmem [shape: f32[8,240], index: 0, kind: input, shape index: {}]   ;;  %s477_s1 = inlined_call_operand.vmem [shape: f32[1,240], index: 1, kind: input, shape index: {}]   ;;  %s478_s2 = inlined_call_operand.vmem [shape: f32[1,240], index: 2, kind: input, shape index: {}]   ;;  %s479_s4 = inlined_call_operand.vmem [shape: f32[1,256], index: 4, kind: input, shape index: {}]   ;;  %s480_s5 = inlined_call_operand.vmem [shape: f32[8,256], index: 5, kind: output, shape index: {}]  }
   0x1   :  { %v83_v0 = vld [vmem:[%s475_s3 + $0xf8] sm:$0xff]  ;;  %v82_v1 = vld [vmem:[%s475_s3 + $0xf0] sm:$0xff]  ;;  %v81_v2 = vld [vmem:[%s475_s3 + $0xe8] sm:$0xff] }
   0x2   :  { %128 = vmatprep.subr.mxu0 %v83_v0  ;;  %v80_v3 = vld [vmem:[%s475_s3 + $0xe0] sm:$0xff]  ;;  %v79_v4 = vld [vmem:[%s475_s3 + $0xd8] sm:$0xff]  ;;  %v78_v5 = vld [vmem:[%s475_s3 + $0xd0] sm:$0xff]  ;;  %v305_v17 = vshrl.u32 %v24_v12, 7 }
   0x3   :  { %129 = vmatpush1.msra.mxu0 %v82_v1  ;;  %v77_v6 = vld [vmem:[%s475_s3 + $0xc8] sm:$0xff]  ;;  %v76_v7 = vld [vmem:[%s475_s3 + $0xc0] sm:$0xff]  ;;  %v75_v8 = vld [vmem:[%s475_s3 + $0xb8] sm:$0xff] }
   0x4   :  { %130 = vmatprep.subr.mxu0 %v81_v2  ;;  %v74_v9 = vld [vmem:[%s475_s3 + $0xb0] sm:$0xff]  ;;  %v73_v10 = vld [vmem:[%s475_s3 + $0xa8] sm:$0xff]  ;;  %v72_v11 = vld [vmem:[%s475_s3 + $0xa0] sm:$0xff]  ;;  %v320_v22 = vsub.s32 1, %v305_v17  ;;  %v26_v55 = vsub.s32 0, %v305_v17 }
   0x5   :  { %131 = vmatpush1.msra.mxu0 %v80_v3  ;;  %v71_v13 = vld [vmem:[%s475_s3 + $0x98] sm:$0xff]  ;;  %v70_v14 = vld [vmem:[%s475_s3 + $0x90] sm:$0xff]  ;;  %v69_v15 = vld [vmem:[%s475_s3 + $0x88] sm:$0xff] }
   0x6   :  { %132 = vmatprep.subr.mxu0 %v79_v4  ;;  %v68_v16 = vld [vmem:[%s475_s3 + $0x80] sm:$0xff]  ;;  %v67_v18 = vld [vmem:[%s475_s3 + $0x78] sm:$0xff]  ;;  %v66_v19 = vld [vmem:[%s475_s3 + $0x70] sm:$0xff] }
   0x7   :  { %133 = vmatpush1.msra.mxu0 %v78_v5  ;;  %v65_v20 = vld [vmem:[%s475_s3 + $0x68] sm:$0xff]  ;;  %v64_v21 = vld [vmem:[%s475_s3 + $0x60] sm:$0xff]  ;;  %v63_v23 = vld [vmem:[%s475_s3 + $0x58] sm:$0xff] }
   0x8   :  { %134 = vmatprep.subr.mxu0 %v77_v6  ;;  %v62_v24 = vld [vmem:[%s475_s3 + $0x50] sm:$0xff]  ;;  %v61_v25 = vld [vmem:[%s475_s3 + $0x48] sm:$0xff]  ;;  %v337_v27 = vld [vmem:[%s477_s1] sm:$0x3] }
   0x9   :  { %135 = vmatpush1.msra.mxu0 %v76_v7  ;;  %v21_v26 = vld [vmem:[%s476_s0 + $0x8] sm:$0xff]  ;;  %v60_v28 = vld [vmem:[%s475_s3 + $0x40] sm:$0xff]  ;;  %v31_v29 = vrot.slane %v337_v27, %v320_v22  ;;  %v59_v31 = vld [vmem:[%s475_s3 + $0x38] sm:$0xff]  ;;  %v27_v60 = vrot.slane %v337_v27, %v26_v55 }
   0xa   :  { %136 = vmatprep.subr.mxu0 %v75_v8  ;;  %v347_v30 = vld [vmem:[%s478_s2] sm:$0x3]  ;;  %v58_v33 = vld [vmem:[%s475_s3 + $0x30] sm:$0xff]  ;;  %v57_v35 = vld [vmem:[%s475_s3 + $0x28] sm:$0xff] }
   0xb   :  { %137 = vmatpush1.msra.mxu0 %v74_v9  ;;  %v45_v32 = vrot.slane %v347_v30, %v320_v22  ;;  %v35_v34 = vmul.f32 %v31_v29, %v21_v26  ;;  %v56_v36 = vld [vmem:[%s475_s3 + $0x20] sm:$0xff]  ;;  %v55_v38 = vld [vmem:[%s475_s3 + $0x18] sm:$0xff]  ;;  %v54_v39 = vld [vmem:[%s475_s3 + $0x10] sm:$0xff]  ;;  %v41_v2 = vrot.slane %v347_v30, %v26_v55 }
   0xc   :  { %138 = vmatprep.subr.mxu0 %v73_v10  ;;  %v53_v41 = vld [vmem:[%s475_s3 + $0x8] sm:$0xff]  ;;  %v52_v42 = vld [vmem:[%s475_s3] sm:$0xff]  ;;  %v111_v43 = vld [vmem:[%s475_s3 + $0x1d8] sm:$0xff] }
   0xd   :  { %139 = vmatpush1.msra.mxu0 %v72_v11  ;;  %v49_v37 = vadd.f32 %v45_v32, %v35_v34  ;;  %v110_v44 = vld [vmem:[%s475_s3 + $0x1d0] sm:$0xff]  ;;  %v109_v45 = vld [vmem:[%s475_s3 + $0x1c8] sm:$0xff]  ;;  %v108_v46 = vld [vmem:[%s475_s3 + $0x1c0] sm:$0xff] }
   0xe   :  { %140 = vmatprep.subr.mxu0 %v71_v13  ;;  %v107_v47 = vld [vmem:[%s475_s3 + $0x1b8] sm:$0xff]  ;;  %v106_v48 = vld [vmem:[%s475_s3 + $0x1b0] sm:$0xff]  ;;  %v105_v49 = vld [vmem:[%s475_s3 + $0x1a8] sm:$0xff] }
   0xf   :  { %141 = vmatpush1.msra.mxu0 %v70_v14  ;;  %v51_v40 = vmax.f32 %v49_v37, 0.0  ;;  %v104_v50 = vld [vmem:[%s475_s3 + $0x1a0] sm:$0xff]  ;;  %v103_v51 = vld [vmem:[%s475_s3 + $0x198] sm:$0xff]  ;;  %v102_v52 = vld [vmem:[%s475_s3 + $0x190] sm:$0xff] }
  0x10   :  { %142 = vmatprep.subr.mxu0 %v69_v15  ;;  %v101_v53 = vld [vmem:[%s475_s3 + $0x188] sm:$0xff]  ;;  %v100_v54 = vld [vmem:[%s475_s3 + $0x180] sm:$0xff]  ;;  %v99_v56 = vld [vmem:[%s475_s3 + $0x178] sm:$0xff] }
  0x11   :  { %143 = vmatpush1.msra.mxu0 %v68_v16  ;;  %220 = vmatprep.mubr.msk.f32.mxu0 %vm124_vm0, %v51_v40  ;;  %v98_v57 = vld [vmem:[%s475_s3 + $0x170] sm:$0xff]  ;;  %v97_v58 = vld [vmem:[%s475_s3 + $0x168] sm:$0xff]  ;;  %v96_v59 = vld [vmem:[%s475_s3 + $0x160] sm:$0xff] }
  0x12   :  { %144 = vmatprep.subr.mxu0 %v67_v18  ;;  %v95_v61 = vld [vmem:[%s475_s3 + $0x158] sm:$0xff]  ;;  %v20_v62 = vld [vmem:[%s476_s0] sm:$0xff]  ;;  %v94_v63 = vld [vmem:[%s475_s3 + $0x150] sm:$0xff] }
  0x13   :  { %145 = vmatpush1.msra.mxu0 %v66_v19  ;;  %v93_v0 = vld [vmem:[%s475_s3 + $0x148] sm:$0xff]  ;;  %v92_v1 = vld [vmem:[%s475_s3 + $0x140] sm:$0xff]  ;;  %v34_v3 = vmul.f32 %v27_v60, %v20_v62  ;;  %v91_v4 = vld [vmem:[%s475_s3 + $0x138] sm:$0xff] }
  0x14   :  { %146 = vmatprep.subr.mxu0 %v65_v20  ;;  %v90_v5 = vld [vmem:[%s475_s3 + $0x130] sm:$0xff]  ;;  %v89_v6 = vld [vmem:[%s475_s3 + $0x128] sm:$0xff]  ;;  %v88_v7 = vld [vmem:[%s475_s3 + $0x120] sm:$0xff] }
  0x15   :  { %147 = vmatpush1.msra.mxu0 %v64_v21  ;;  %v48_v8 = vadd.f32 %v41_v2, %v34_v3  ;;  %v87_v9 = vld [vmem:[%s475_s3 + $0x118] sm:$0xff]  ;;  %v86_v10 = vld [vmem:[%s475_s3 + $0x110] sm:$0xff]  ;;  %v85_v11 = vld [vmem:[%s475_s3 + $0x108] sm:$0xff] }
  0x16   :  { %148 = vmatprep.subr.mxu0 %v63_v23  ;;  %v84_v12 = vld [vmem:[%s475_s3 + $0x100] sm:$0xff] }
  0x17   :  { %149 = vmatpush1.msra.mxu0 %v62_v24  ;;  %v50_v13 = vmax.f32 %v48_v8, 0.0  ;;  %v112_v14 = vld [vmem:[%s479_s4] sm:$0x3] }
  0x18   :  { %150 = vmatprep.subr.mxu0 %v61_v25  ;;  %v117_v15 = vrot.slane %v112_v14, %v26_v55  ;;  %v121_v16 = vrot.slane %v112_v14, %v320_v22 }
  0x19   :  { %151 = vmatpush1.msra.mxu0 %v60_v28 }
  0x1a   :  { %152 = vmatprep.subr.mxu0 %v59_v31 }
  0x1b   :  { %153 = vmatpush1.msra.mxu0 %v58_v33 }
  0x1c   :  { %154 = vmatprep.subr.mxu0 %v57_v35 }
  0x1d   :  { %155 = vmatpush1.msra.mxu0 %v56_v36 }
  0x1e   :  { %156 = vmatprep.subr.mxu0 %v55_v38 }
  0x1f   :  { %157 = vmatpush1.msra.mxu0 %v54_v39 }
  0x20   :  { %158 = vmatprep.subr.mxu0 %v53_v41 }
  0x21   :  { %159 = vmatpush1.msra.mxu0 %v52_v42 }
  0x22   :  { %164 = vmatprep.subr.mxu0 %v111_v43 }
  0x23   :  { %165 = vmatpush2.msra.mxu0 %v110_v44 }
  0x24   :  { %166 = vmatprep.subr.mxu0 %v109_v45 }
  0x25   :  { %167 = vmatpush2.msra.mxu0 %v108_v46 }
  0x26   :  { %168 = vmatprep.subr.mxu0 %v107_v47 }
  0x27   :  { %169 = vmatpush2.msra.mxu0 %v106_v48 }
  0x28   :  { %170 = vmatprep.subr.mxu0 %v105_v49 }
  0x29   :  { %171 = vmatpush2.msra.mxu0 %v104_v50 }
  0x2a   :  { %172 = vmatprep.subr.mxu0 %v103_v51 }
  0x2b   :  { %173 = vmatpush2.msra.mxu0 %v102_v52 }
  0x2c   :  { %174 = vmatprep.subr.mxu0 %v101_v53 }
  0x2d   :  { %175 = vmatpush2.msra.mxu0 %v100_v54 }
  0x2e   :  { %176 = vmatprep.subr.mxu0 %v99_v56 }
  0x2f   :  { %177 = vmatpush2.msra.mxu0 %v98_v57 }
  0x30   :  { %178 = vmatprep.subr.mxu0 %v97_v58 }
  0x31   :  { %179 = vmatpush2.msra.mxu0 %v96_v59 }
  0x32   :  { %180 = vmatprep.subr.mxu0 %v95_v61 }
  0x33   :  { %181 = vmatpush2.msra.mxu0 %v94_v63 }
  0x34   :  { %182 = vmatprep.subr.mxu0 %v93_v0 }
  0x35   :  { %183 = vmatpush2.msra.mxu0 %v92_v1 }
  0x36   :  { %184 = vmatprep.subr.mxu0 %v91_v4 }
  0x37   :  { %185 = vmatpush2.msra.mxu0 %v90_v5 }
  0x38   :  { %186 = vmatprep.subr.mxu0 %v89_v6 }
  0x39   :  { %187 = vmatpush2.msra.mxu0 %v88_v7 }
  0x3a   :  { %188 = vmatprep.subr.mxu0 %v87_v9 }
  0x3b   :  { %189 = vmatpush2.msra.mxu0 %v86_v10 }
  0x3c   :  { %190 = vmatprep.subr.mxu0 %v85_v11 }
  0x3d   :  { %191 = vmatpush2.msra.mxu0 %v84_v12 }
  0x3e   :  { %193 = vmatmul.mubr.f32.vlgmr.msra.gmra.mxu0 %v50_v13 }
  0xfe   :  { %v194_v17 = vpop.f32.mrf.mxu0 }
  0xff   :  { %v195_v19 = vadd.f32 %v194_v17, %v117_v15 }
 0x100   :  { %v196_v18 = vpop.f32.mrf.mxu0 }
 0x101   :  { %v197_v20 = vadd.f32 %v196_v18, %v121_v16 }
 0x103   :  { %v199_v21 = vmax.f32 %v195_v19, %v197_v20 }
 0x105   :  { %200 = vmax.xlane.f32.xlu0 %v199_v21 }
 0x18e   :  { %v201_v23 = vpop.xlane.xlu0 %200 }
 0x18f   :  { %v202_v24 = vsub.f32 %v195_v19, %v201_v23  ;;  %v203_v25 = vsub.f32 %v197_v20, %v201_v23 }
 0x191   :  { %v204_v26 = vmul.f32 1.442695, %v202_v24  ;;  %v206_v27 = vmul.f32 1.442695, %v203_v25 }
 0x193   :  { %221 = vpow2.f32 %v204_v26 }
 0x194   :  { %223 = vpow2.f32 %v206_v27 }
 0x1a0   :  { %v222_v28 = vpop.eup %221 }
 0x1a1   :  { %v224_v29 = vpop.eup %223 }
 0x1a2   :  { %v208_v30 = vadd.f32 %v224_v29, %v222_v28 }
 0x1a4   :  { %209 = vadd.xlane.f32.xlu0 %v208_v30 }
 0x22d   :  { %v210_v31 = vpop.xlane.xlu0 %209 }
 0x22e   :  { %225 = vrcp.f32 %v210_v31 }
 0x23b   :  { %v226_v22 = vpop.eup %225 }
 0x23c   :  { %v212_v32 = vmul.f32 %v226_v22, %v222_v28  ;;  %v213_v33 = vmul.f32 %v226_v22, %v224_v29 }
 0x23e   :  { %214 = vst [vmem:[%s480_s5] sm:$0xff] %v212_v32  ;;  %215 = vst [vmem:[%s480_s5 + $0x8] sm:$0xff] %v213_v33 }

// kernel: mixture_nn_forward.3
= control target key start
LH: loop header
LB: loop body
LE: loop exit
PB: predicated region body
PF: predicated region fallthrough
CT: control target
= control target key end

     0   :  { %18 = vsyncpa [#allocation3], 0  ;;  %s1379_s25 = smov [#allocation2]   ;;  %s2654_s0 = inlined_call_operand.vmem [shape: f32[8,16], index: 0, kind: input, shape index: {}]   ;;  %s2655_s1 = inlined_call_operand.vmem [shape: f32[8,192], index: 1, kind: input, shape index: {}]   ;;  %s2656_s2 = inlined_call_operand.vmem [shape: f32[16,200], index: 2, kind: input, shape index: {}]   ;;  %s2657_s3 = inlined_call_operand.vmem [shape: f32[1,200], index: 3, kind: input, shape index: {}]   ;;  %s2658_s4 = inlined_call_operand.vmem [shape: f32[200,100], index: 4, kind: input, shape index: {}]   ;;  %s2659_s5 = inlined_call_operand.vmem [shape: f32[1,100], index: 5, kind: input, shape index: {}]   ;;  %s2660_s6 = inlined_call_operand.vmem [shape: f32[192,484], index: 6, kind: input, shape index: {}]   ;;  %s2661_s7 = inlined_call_operand.vmem [shape: f32[1,484], index: 7, kind: input, shape index: {}]   ;;  %s2662_s8 = inlined_call_operand.vmem [shape: f32[484,220], index: 8, kind: input, shape index: {}]   ;;  %s2663_s9 = inlined_call_operand.vmem [shape: f32[1,220], index: 9, kind: input, shape index: {}]   ;;  %s2664_s10 = inlined_call_operand.hbm [shape: f32[100,480], index: 10, kind: input, shape index: {}]   ;;  %s2665_s11 = inlined_call_operand.vmem [shape: f32[220,480], index: 11, kind: input, shape index: {}]   ;;  %s2666_s12 = inlined_call_operand.vmem [shape: f32[1,480], index: 12, kind: input, shape index: {}]   ;;  %s2667_s13 = inlined_call_operand.vmem [shape: f32[8,480], index: 13, kind: output, shape index: {}]  }
   0x1   :  { %s44_s26 = sshll.u32 %s1379_s25, 4  ;;  %s45_s26 = int_to_ptr.vmem [resolvable:$true] %s44_s26 }
   0x2   :  { %s1365_s27 = scalar_lea.vmem %s45_s26, 6656  ;;  %p1370_p1 = scmp.lt.s32.totalorder %s45_s26, %s45_s26 }
   0x3   :  { %p1366_p0 = scmp.ne.s32.totalorder %s45_s26, %s1365_s27  ;;  %p1371_p2 = scmp.lt.s32.totalorder %s1365_s27, %s1365_s27 }
   0x5   :  { %p1372_p3 = por %p1371_p2, %p1370_p1 }
   0x7   :  { %p1373_p4 = pnand %p1372_p3, %p1366_p0 }
   0x9   :  { %1376 = shalt.err (!%p1373_p4)
}
   0xa   :  { %s1380_s28 = smov 512   ;;  %s1381_s29 = smov 32  }
   0xb   :  { %50 = dma.hbm_to_vmem [thread:$0]  %s2664_s10, 6656, %s45_s26, [#allocation3], %s1380_s28, %s1380_s28, %s1381_s29  }
   0xc   :  { %1377 = dma.done.wait [#allocation3], 6656  }
   0xd   :  { %1378 = vsyncadd [#allocation3], 4294960640  ;;  %v1382_v0 = vmov 0.0   ;;  %v62_v1 = vld [vmem:[%s2656_s2 + $0x18] sm:$0xff]  ;;  %v61_v2 = vld [vmem:[%s2656_s2 + $0x10] sm:$0xff]  ;;  %vm75_vm0 = vcmask 130048  }
   0xe   :  { %143 = vmatprep.mubr.f32.mxu1 %v1382_v0  ;;  %v60_v3 = vld [vmem:[%s2656_s2 + $0x8] sm:$0xff]  ;;  %107 = vmatprep.subr.mxu1 %v62_v1  ;;  %v59_v4 = vld [vmem:[%s2656_s2] sm:$0xff]  ;;  %v167_v6 = vld [vmem:[%s2658_s4 + $0x78] sm:$0xff]  ;;  %vm379_vm1 = vcmask 523264   ;;  %vm184_vm2 = vcmask 588800   ;;  %vm667_vm3 = vcmask 1043456  }
   0xf   :  { %108 = vmatpush1.msra.mxu1 %v61_v2  ;;  %v58_v5 = vld [vmem:[%s2654_s0] sm:$0xff]  ;;  %v166_v7 = vld [vmem:[%s2658_s4 + $0x70] sm:$0xff]  ;;  %v165_v8 = vld [vmem:[%s2658_s4 + $0x68] sm:$0xff]  ;;  %vm663_vm4 = vcmask 818176   ;;  %vm982_vm5 = vcmask 752640   ;;  %vm1326_vm6 = vcmask 785408  }
  0x10   :  { %109 = vmatprep.subr.mxu1 %v60_v3  ;;  %v164_v9 = vld [vmem:[%s2658_s4 + $0x60] sm:$0xff]  ;;  %v163_v10 = vld [vmem:[%s2658_s4 + $0x58] sm:$0xff]  ;;  %v162_v11 = vld [vmem:[%s2658_s4 + $0x50] sm:$0xff] }
  0x11   :  { %110 = vmatpush1.msra.mxu1 %v59_v4  ;;  %v161_v12 = vld [vmem:[%s2658_s4 + $0x48] sm:$0xff]  ;;  %v160_v13 = vld [vmem:[%s2658_s4 + $0x40] sm:$0xff]  ;;  %v159_v14 = vld [vmem:[%s2658_s4 + $0x38] sm:$0xff] }
  0x12   :  { %1333 = vmatmul.mubr.msk.f32.vlgmr.msra.gmra.mxu1 %vm75_vm0, %v58_v5  ;;  %188 = vmatprep.subr.mxu1 %v1382_v0  ;;  %v158_v15 = vld [vmem:[%s2658_s4 + $0x30] sm:$0xff]  ;;  %v157_v16 = vld [vmem:[%s2658_s4 + $0x28] sm:$0xff]  ;;  %v156_v17 = vld [vmem:[%s2658_s4 + $0x20] sm:$0xff] }
  0x13   :  { %189 = vmatpush1.msra.mxu1 %v167_v6  ;;  %v155_v18 = vld [vmem:[%s2658_s4 + $0x18] sm:$0xff]  ;;  %v154_v19 = vld [vmem:[%s2658_s4 + $0x10] sm:$0xff]  ;;  %v153_v20 = vld [vmem:[%s2658_s4 + $0x8] sm:$0xff] }
  0x14   :  { %190 = vmatprep.subr.mxu1 %v1382_v0  ;;  %v152_v21 = vld [vmem:[%s2658_s4] sm:$0xff]  ;;  %v175_v23 = vld [vmem:[%s2658_s4 + $0xb8] sm:$0xff]  ;;  %v174_v24 = vld [vmem:[%s2658_s4 + $0xb0] sm:$0xff] }
  0x15   :  { %191 = vmatpush1.msra.mxu1 %v166_v7  ;;  %v176_v22 = vld [vmem:[%s2658_s4 + $0xc0] sm:$0xff]  ;;  %v173_v25 = vld [vmem:[%s2658_s4 + $0xa8] sm:$0xff]  ;;  %v171_v27 = vld [vmem:[%s2658_s4 + $0x98] sm:$0xff] }
  0x16   :  { %192 = vmatprep.subr.mxu1 %v1382_v0  ;;  %v172_v26 = vld [vmem:[%s2658_s4 + $0xa0] sm:$0xff]  ;;  %v322_v28 = vld [vmem:[%s2660_s6 + $0x1e8] sm:$0xff]  ;;  %v170_v30 = vld [vmem:[%s2658_s4 + $0x90] sm:$0xff] }
  0x17   :  { %193 = vmatpush1.msra.mxu1 %v165_v8  ;;  %383 = vmatprep.subr.mxu0 %v322_v28  ;;  %v321_v29 = vld [vmem:[%s2660_s6 + $0x1e0] sm:$0xff]  ;;  %v318_v31 = vld [vmem:[%s2660_s6 + $0x1c8] sm:$0xff]  ;;  %v324_v39 = vld [vmem:[%s2660_s6 + $0x1f8] sm:$0xff] }
  0x18   :  { %194 = vmatprep.subr.mxu1 %v1382_v0  ;;  %384 = vmatpush1.msra.mxu0 %v321_v29  ;;  %v317_v32 = vld [vmem:[%s2660_s6 + $0x1c0] sm:$0xff]  ;;  %v169_v33 = vld [vmem:[%s2658_s4 + $0x88] sm:$0xff]  ;;  %v551_v28 = vld [vmem:[%s2662_s8 + $0xb0] sm:$0xff] }
  0x19   :  { %195 = vmatpush1.msra.mxu1 %v164_v9  ;;  %385 = vmatprep.subr.mxu0 %v318_v31  ;;  %v314_v34 = vld [vmem:[%s2660_s6 + $0x1a8] sm:$0xff]  ;;  %v313_v35 = vld [vmem:[%s2660_s6 + $0x1a0] sm:$0xff]  ;;  %v548_v31 = vld [vmem:[%s2662_s8 + $0x98] sm:$0xff] }
  0x1a   :  { %196 = vmatprep.subr.mxu1 %v1382_v0  ;;  %386 = vmatpush1.msra.mxu0 %v317_v32  ;;  %v168_v36 = vld [vmem:[%s2658_s4 + $0x80] sm:$0xff]  ;;  %v310_v37 = vld [vmem:[%s2660_s6 + $0x188] sm:$0xff]  ;;  %v547_v32 = vld [vmem:[%s2662_s8 + $0x90] sm:$0xff] }
  0x1b   :  { %197 = vmatpush1.msra.mxu1 %v163_v10  ;;  %387 = vmatprep.subr.mxu0 %v314_v34  ;;  %v309_v38 = vld [vmem:[%s2660_s6 + $0x180] sm:$0xff]  ;;  %v306_v40 = vld [vmem:[%s2660_s6 + $0x168] sm:$0xff] }
  0x1c   :  { %198 = vmatprep.subr.mxu1 %v1382_v0  ;;  %388 = vmatpush1.msra.mxu0 %v313_v35  ;;  %v305_v41 = vld [vmem:[%s2660_s6 + $0x160] sm:$0xff]  ;;  %v302_v42 = vld [vmem:[%s2660_s6 + $0x148] sm:$0xff]  ;;  %v65_v35 = vlaneseq }
  0x1d   :  { %199 = vmatpush1.msra.mxu1 %v162_v11  ;;  %389 = vmatprep.subr.mxu0 %v310_v37  ;;  %v301_v43 = vld [vmem:[%s2660_s6 + $0x140] sm:$0xff]  ;;  %v298_v44 = vld [vmem:[%s2660_s6 + $0x128] sm:$0xff] }
  0x1e   :  { %200 = vmatprep.subr.mxu1 %v1382_v0  ;;  %390 = vmatpush1.msra.mxu0 %v309_v38  ;;  %v297_v45 = vld [vmem:[%s2660_s6 + $0x120] sm:$0xff]  ;;  %v294_v46 = vld [vmem:[%s2660_s6 + $0x108] sm:$0xff] }
  0x1f   :  { %201 = vmatpush1.msra.mxu1 %v161_v12  ;;  %391 = vmatprep.subr.mxu0 %v306_v40  ;;  %v293_v47 = vld [vmem:[%s2660_s6 + $0x100] sm:$0xff]  ;;  %v290_v48 = vld [vmem:[%s2660_s6 + $0xe8] sm:$0xff] }
  0x20   :  { %202 = vmatprep.subr.mxu1 %v1382_v0  ;;  %392 = vmatpush1.msra.mxu0 %v305_v41  ;;  %v289_v49 = vld [vmem:[%s2660_s6 + $0xe0] sm:$0xff]  ;;  %v286_v50 = vld [vmem:[%s2660_s6 + $0xc8] sm:$0xff] }
  0x21   :  { %203 = vmatpush1.msra.mxu1 %v160_v13  ;;  %393 = vmatprep.subr.mxu0 %v302_v42  ;;  %v285_v51 = vld [vmem:[%s2660_s6 + $0xc0] sm:$0xff]  ;;  %v282_v52 = vld [vmem:[%s2660_s6 + $0xa8] sm:$0xff] }
  0x22   :  { %204 = vmatprep.subr.mxu1 %v1382_v0  ;;  %394 = vmatpush1.msra.mxu0 %v301_v43  ;;  %v281_v53 = vld [vmem:[%s2660_s6 + $0xa0] sm:$0xff]  ;;  %v278_v54 = vld [vmem:[%s2660_s6 + $0x88] sm:$0xff] }
  0x23   :  { %205 = vmatpush1.msra.mxu1 %v159_v14  ;;  %395 = vmatprep.subr.mxu0 %v298_v44  ;;  %v277_v55 = vld [vmem:[%s2660_s6 + $0x80] sm:$0xff]  ;;  %v274_v56 = vld [vmem:[%s2660_s6 + $0x68] sm:$0xff] }
  0x24   :  { %206 = vmatprep.subr.mxu1 %v1382_v0  ;;  %396 = vmatpush1.msra.mxu0 %v297_v45  ;;  %v273_v57 = vld [vmem:[%s2660_s6 + $0x60] sm:$0xff]  ;;  %v270_v58 = vld [vmem:[%s2660_s6 + $0x48] sm:$0xff] }
  0x25   :  { %207 = vmatpush1.msra.mxu1 %v158_v15  ;;  %397 = vmatprep.subr.mxu0 %v294_v46  ;;  %v269_v59 = vld [vmem:[%s2660_s6 + $0x40] sm:$0xff]  ;;  %v266_v60 = vld [vmem:[%s2660_s6 + $0x28] sm:$0xff] }
  0x26   :  { %208 = vmatprep.subr.mxu1 %v1382_v0  ;;  %398 = vmatpush1.msra.mxu0 %v293_v47  ;;  %v265_v61 = vld [vmem:[%s2660_s6 + $0x20] sm:$0xff]  ;;  %v262_v62 = vld [vmem:[%s2660_s6 + $0x8] sm:$0xff] }
  0x27   :  { %209 = vmatpush1.msra.mxu1 %v157_v16  ;;  %399 = vmatprep.subr.mxu0 %v290_v48  ;;  %v261_v63 = vld [vmem:[%s2660_s6] sm:$0xff]  ;;  %v354_v1 = vld [vmem:[%s2660_s6 + $0x2e8] sm:$0xff]  ;;  %v323_v48 = vld [vmem:[%s2660_s6 + $0x1f0] sm:$0xff] }
  0x28   :  { %210 = vmatprep.subr.mxu1 %v1382_v0  ;;  %400 = vmatpush1.msra.mxu0 %v289_v49  ;;  %v353_v2 = vld [vmem:[%s2660_s6 + $0x2e0] sm:$0xff]  ;;  %v350_v3 = vld [vmem:[%s2660_s6 + $0x2c8] sm:$0xff]  ;;  %v320_v49 = vld [vmem:[%s2660_s6 + $0x1d8] sm:$0xff] }
  0x29   :  { %211 = vmatpush1.msra.mxu1 %v156_v17  ;;  %401 = vmatprep.subr.mxu0 %v286_v50  ;;  %v349_v4 = vld [vmem:[%s2660_s6 + $0x2c0] sm:$0xff]  ;;  %v346_v5 = vld [vmem:[%s2660_s6 + $0x2a8] sm:$0xff]  ;;  %v319_v50 = vld [vmem:[%s2660_s6 + $0x1d0] sm:$0xff] }
  0x2a   :  { %212 = vmatprep.subr.mxu1 %v1382_v0  ;;  %402 = vmatpush1.msra.mxu0 %v285_v51  ;;  %v345_v6 = vld [vmem:[%s2660_s6 + $0x2a0] sm:$0xff]  ;;  %v342_v7 = vld [vmem:[%s2660_s6 + $0x288] sm:$0xff]  ;;  %v316_v51 = vld [vmem:[%s2660_s6 + $0x1b8] sm:$0xff] }
  0x2b   :  { %213 = vmatpush1.msra.mxu1 %v155_v18  ;;  %403 = vmatprep.subr.mxu0 %v282_v52  ;;  %v341_v8 = vld [vmem:[%s2660_s6 + $0x280] sm:$0xff]  ;;  %v338_v9 = vld [vmem:[%s2660_s6 + $0x268] sm:$0xff]  ;;  %v315_v52 = vld [vmem:[%s2660_s6 + $0x1b0] sm:$0xff] }
  0x2c   :  { %214 = vmatprep.subr.mxu1 %v1382_v0  ;;  %404 = vmatpush1.msra.mxu0 %v281_v53  ;;  %v337_v10 = vld [vmem:[%s2660_s6 + $0x260] sm:$0xff]  ;;  %v334_v11 = vld [vmem:[%s2660_s6 + $0x248] sm:$0xff]  ;;  %v312_v53 = vld [vmem:[%s2660_s6 + $0x198] sm:$0xff] }
  0x2d   :  { %215 = vmatpush1.msra.mxu1 %v154_v19  ;;  %405 = vmatprep.subr.mxu0 %v278_v54  ;;  %v333_v12 = vld [vmem:[%s2660_s6 + $0x240] sm:$0xff]  ;;  %v330_v13 = vld [vmem:[%s2660_s6 + $0x228] sm:$0xff]  ;;  %v560_v19 = vld [vmem:[%s2662_s8 + $0xf8] sm:$0xff] }
  0x2e   :  { %216 = vmatprep.subr.mxu1 %v1382_v0  ;;  %406 = vmatpush1.msra.mxu0 %v277_v55  ;;  %v329_v14 = vld [vmem:[%s2660_s6 + $0x220] sm:$0xff]  ;;  %v326_v15 = vld [vmem:[%s2660_s6 + $0x208] sm:$0xff]  ;;  %v311_v54 = vld [vmem:[%s2660_s6 + $0x190] sm:$0xff] }
  0x2f   :  { %217 = vmatpush1.msra.mxu1 %v153_v20  ;;  %407 = vmatprep.subr.mxu0 %v274_v56  ;;  %v325_v16 = vld [vmem:[%s2660_s6 + $0x200] sm:$0xff]  ;;  %v260_v17 = vld [vmem:[%s2655_s1 + $0x8] sm:$0xff]  ;;  %v559_v20 = vld [vmem:[%s2662_s8 + $0xf0] sm:$0xff] }
  0x30   :  { %218 = vmatprep.subr.mxu1 %v1382_v0  ;;  %408 = vmatpush1.msra.mxu0 %v273_v57  ;;  %v1726_v18 = vld [vmem:[%s2655_s1] sm:$0xff]  ;;  %v550_v29 = vld [vmem:[%s2662_s8 + $0xa8] sm:$0xff]  ;;  %v308_v55 = vld [vmem:[%s2660_s6 + $0x178] sm:$0xff] }
  0x31   :  { %219 = vmatpush1.msra.mxu1 %v152_v21  ;;  %409 = vmatprep.subr.mxu0 %v270_v58  ;;  %v558_v21 = vld [vmem:[%s2662_s8 + $0xe8] sm:$0xff]  ;;  %v545_v34 = vld [vmem:[%s2662_s8 + $0x80] sm:$0xff]  ;;  %v307_v56 = vld [vmem:[%s2660_s6 + $0x170] sm:$0xff] }
  0x32   :  { %234 = vmatprep.subr.mxu1 %v1382_v0  ;;  %410 = vmatpush1.msra.mxu0 %v269_v59  ;;  %v63_v38 = vld [vmem:[%s2657_s3] sm:$0x3]  ;;  %v304_v57 = vld [vmem:[%s2660_s6 + $0x158] sm:$0xff]  ;;  %v303_v58 = vld [vmem:[%s2660_s6 + $0x150] sm:$0xff] }
  0x33   :  { %235 = vmatpush2.msra.mxu1 %v176_v22  ;;  %411 = vmatprep.subr.mxu0 %v266_v60  ;;  %v557_v22 = vld [vmem:[%s2662_s8 + $0xe0] sm:$0xff]  ;;  %v300_v59 = vld [vmem:[%s2660_s6 + $0x138] sm:$0xff]  ;;  %v299_v60 = vld [vmem:[%s2660_s6 + $0x130] sm:$0xff] }
  0x34   :  { %236 = vmatprep.subr.mxu1 %v1382_v0  ;;  %412 = vmatpush1.msra.mxu0 %v265_v61  ;;  %v296_v61 = vld [vmem:[%s2660_s6 + $0x118] sm:$0xff] }
  0x35   :  { %237 = vmatpush2.msra.mxu1 %v175_v23  ;;  %413 = vmatprep.subr.mxu0 %v262_v62  ;;  %v556_v23 = vld [vmem:[%s2662_s8 + $0xd8] sm:$0xff]  ;;  %v295_v62 = vld [vmem:[%s2660_s6 + $0x110] sm:$0xff] }
  0x36   :  { %238 = vmatprep.subr.mxu1 %v1382_v0  ;;  %414 = vmatpush1.msra.mxu0 %v261_v63  ;;  %v292_v63 = vld [vmem:[%s2660_s6 + $0xf8] sm:$0xff] }
  0x37   :  { %239 = vmatpush2.msra.mxu1 %v174_v24  ;;  %431 = vmatprep.subr.mxu0 %v354_v1  ;;  %v555_v24 = vld [vmem:[%s2662_s8 + $0xd0] sm:$0xff] }
  0x38   :  { %240 = vmatprep.subr.mxu1 %v1382_v0  ;;  %432 = vmatpush2.msra.mxu0 %v353_v2  ;;  %v291_v1 = vld [vmem:[%s2660_s6 + $0xf0] sm:$0xff]  ;;  %v288_v2 = vld [vmem:[%s2660_s6 + $0xd8] sm:$0xff] }
  0x39   :  { %241 = vmatpush2.msra.mxu1 %v173_v25  ;;  %433 = vmatprep.subr.mxu0 %v350_v3  ;;  %v554_v25 = vld [vmem:[%s2662_s8 + $0xc8] sm:$0xff]  ;;  %v287_v3 = vld [vmem:[%s2660_s6 + $0xd0] sm:$0xff] }
  0x3a   :  { %242 = vmatprep.subr.mxu1 %v1382_v0  ;;  %434 = vmatpush2.msra.mxu0 %v349_v4  ;;  %v284_v4 = vld [vmem:[%s2660_s6 + $0xb8] sm:$0xff] }
  0x3b   :  { %243 = vmatpush2.msra.mxu1 %v172_v26  ;;  %435 = vmatprep.subr.mxu0 %v346_v5  ;;  %v553_v26 = vld [vmem:[%s2662_s8 + $0xc0] sm:$0xff]  ;;  %v283_v5 = vld [vmem:[%s2660_s6 + $0xb0] sm:$0xff] }
  0x3c   :  { %244 = vmatprep.subr.mxu1 %v1382_v0  ;;  %436 = vmatpush2.msra.mxu0 %v345_v6  ;;  %v280_v6 = vld [vmem:[%s2660_s6 + $0x98] sm:$0xff] }
  0x3d   :  { %245 = vmatpush2.msra.mxu1 %v171_v27  ;;  %437 = vmatprep.subr.mxu0 %v342_v7  ;;  %v552_v27 = vld [vmem:[%s2662_s8 + $0xb8] sm:$0xff]  ;;  %v279_v7 = vld [vmem:[%s2660_s6 + $0x90] sm:$0xff] }
  0x3e   :  { %246 = vmatprep.subr.mxu1 %v1382_v0  ;;  %438 = vmatpush2.msra.mxu0 %v341_v8  ;;  %v276_v8 = vld [vmem:[%s2660_s6 + $0x78] sm:$0xff] }
  0x3f   :  { %247 = vmatpush2.msra.mxu1 %v170_v30  ;;  %439 = vmatprep.subr.mxu0 %v338_v9  ;;  %v549_v30 = vld [vmem:[%s2662_s8 + $0xa0] sm:$0xff]  ;;  %v275_v9 = vld [vmem:[%s2660_s6 + $0x70] sm:$0xff] }
  0x40   :  { %248 = vmatprep.subr.mxu1 %v1382_v0  ;;  %440 = vmatpush2.msra.mxu0 %v337_v10  ;;  %v272_v10 = vld [vmem:[%s2660_s6 + $0x58] sm:$0xff] }
  0x41   :  { %249 = vmatpush2.msra.mxu1 %v169_v33  ;;  %441 = vmatprep.subr.mxu0 %v334_v11  ;;  %v546_v33 = vld [vmem:[%s2662_s8 + $0x88] sm:$0xff]  ;;  %v271_v11 = vld [vmem:[%s2660_s6 + $0x50] sm:$0xff] }
  0x42   :  { %250 = vmatprep.subr.mxu1 %v1382_v0  ;;  %442 = vmatpush2.msra.mxu0 %v333_v12  ;;  %v268_v12 = vld [vmem:[%s2660_s6 + $0x38] sm:$0xff] }
  0x43   :  { %251 = vmatpush2.msra.mxu1 %v168_v36  ;;  %443 = vmatprep.subr.mxu0 %v330_v13  ;;  %v1777_v36 = vshrl.u32 %v65_v35, 7  ;;  %v267_v13 = vld [vmem:[%s2660_s6 + $0x30] sm:$0xff]  ;;  %v622_v35 = vld [vmem:[%s2662_s8 + $0x2e8] sm:$0xff] }
  0x44   :  { %454 = vmatprep.subr.mxu1 %v324_v39  ;;  %444 = vmatpush2.msra.mxu0 %v329_v14  ;;  %v264_v14 = vld [vmem:[%s2660_s6 + $0x18] sm:$0xff] }
  0x45   :  { %445 = vmatprep.subr.mxu0 %v326_v15  ;;  %1336 = vmatprep.mubr.msk.f32.mxu0 %vm379_vm1, %v260_v17  ;;  %v1780_v37 = vsub.s32 0, %v1777_v36  ;;  %v1786_v39 = vsub.s32 1, %v1777_v36  ;;  %v263_v15 = vld [vmem:[%s2660_s6 + $0x10] sm:$0xff] }
  0x46   :  { %446 = vmatpush2.msra.mxu0 %v325_v16  ;;  %v356_v16 = vld [vmem:[%s2660_s6 + $0x2f8] sm:$0xff] }
  0x47   :  { %448 = vmatmul.mubr.f32.vlgmr.msra.gmra.mxu0 %v1726_v18  ;;  %674 = vmatprep.subr.mxu0 %v560_v19  ;;  %v68_v40 = vrot.slane %v63_v38, %v1780_v37  ;;  %v72_v41 = vrot.slane %v63_v38, %v1786_v39  ;;  %v352_v19 = vld [vmem:[%s2660_s6 + $0x2d8] sm:$0xff] }
  0x48   :  { %675 = vmatpush1.msra.mxu0 %v559_v20  ;;  %v351_v20 = vld [vmem:[%s2660_s6 + $0x2d0] sm:$0xff]  ;;  %v544_v38 = vld [vmem:[%s2662_s8 + $0x78] sm:$0xff] }
  0x49   :  { %676 = vmatprep.subr.mxu0 %v558_v21  ;;  %v348_v21 = vld [vmem:[%s2660_s6 + $0x2b8] sm:$0xff] }
  0x4a   :  { %677 = vmatpush1.msra.mxu0 %v557_v22  ;;  %v347_v22 = vld [vmem:[%s2660_s6 + $0x2b0] sm:$0xff] }
  0x4b   :  { %678 = vmatprep.subr.mxu0 %v556_v23  ;;  %v344_v23 = vld [vmem:[%s2660_s6 + $0x298] sm:$0xff] }
  0x4c   :  { %679 = vmatpush1.msra.mxu0 %v555_v24  ;;  %v343_v24 = vld [vmem:[%s2660_s6 + $0x290] sm:$0xff] }
  0x4d   :  { %680 = vmatprep.subr.mxu0 %v554_v25  ;;  %v340_v25 = vld [vmem:[%s2660_s6 + $0x278] sm:$0xff] }
  0x4e   :  { %681 = vmatpush1.msra.mxu0 %v553_v26  ;;  %v339_v26 = vld [vmem:[%s2660_s6 + $0x270] sm:$0xff] }
  0x4f   :  { %682 = vmatprep.subr.mxu0 %v552_v27  ;;  %v336_v27 = vld [vmem:[%s2660_s6 + $0x258] sm:$0xff] }
  0x50   :  { %683 = vmatpush1.msra.mxu0 %v551_v28  ;;  %v335_v28 = vld [vmem:[%s2660_s6 + $0x250] sm:$0xff] }
  0x51   :  { %684 = vmatprep.subr.mxu0 %v550_v29  ;;  %v332_v29 = vld [vmem:[%s2660_s6 + $0x238] sm:$0xff] }
  0x52   :  { %685 = vmatpush1.msra.mxu0 %v549_v30  ;;  %v331_v30 = vld [vmem:[%s2660_s6 + $0x230] sm:$0xff] }
  0x53   :  { %686 = vmatprep.subr.mxu0 %v548_v31  ;;  %v328_v31 = vld [vmem:[%s2660_s6 + $0x218] sm:$0xff] }
  0x54   :  { %687 = vmatpush1.msra.mxu0 %v547_v32  ;;  %v327_v32 = vld [vmem:[%s2660_s6 + $0x210] sm:$0xff] }
  0x55   :  { %688 = vmatprep.subr.mxu0 %v546_v33  ;;  %v624_v33 = vld [vmem:[%s2662_s8 + $0x2f8] sm:$0xff] }
  0x56   :  { %689 = vmatpush1.msra.mxu0 %v545_v34  ;;  %v623_v34 = vld [vmem:[%s2662_s8 + $0x2f0] sm:$0xff] }
  0x57   :  { %690 = vmatprep.subr.mxu0 %v544_v38  ;;  %v578_v38 = vld [vmem:[%s2662_s8 + $0x188] sm:$0xff] }
  0xd2   :  { %v145_v42 = vpop.f32.mrf.mxu1 }
  0xd3   :  { %v146_v43 = vadd.f32 %v145_v42, %v68_v40  ;;  %v621_v40 = vld [vmem:[%s2662_s8 + $0x2e0] sm:$0xff]  ;;  %v542_v42 = vld [vmem:[%s2662_s8 + $0x68] sm:$0xff] }
  0xd4   :  { %v147_v44 = vpop.f32.mrf.mxu1 }
  0xd5   :  { %v148_v45 = vadd.f32 %v147_v44, %v72_v41  ;;  %v150_v47 = vmax.f32 %v146_v43, 0.0  ;;  %v543_v41 = vld [vmem:[%s2662_s8 + $0x70] sm:$0xff]  ;;  %v541_v44 = vld [vmem:[%s2662_s8 + $0x60] sm:$0xff] }
  0xd6   :  { %691 = vmatpush1.msra.mxu0 %v543_v41  ;;  %v619_v43 = vld [vmem:[%s2662_s8 + $0x2d0] sm:$0xff]  ;;  %v577_v41 = vld [vmem:[%s2662_s8 + $0x180] sm:$0xff] }
  0xd7   :  { %v151_v46 = vmax.f32 %v148_v45, 0.0  ;;  %692 = vmatprep.subr.mxu0 %v542_v42  ;;  %v618_v45 = vld [vmem:[%s2662_s8 + $0x2c8] sm:$0xff]  ;;  %v576_v42 = vld [vmem:[%s2662_s8 + $0x178] sm:$0xff] }
  0xd8   :  { %693 = vmatpush1.msra.mxu0 %v541_v44  ;;  %v575_v44 = vld [vmem:[%s2662_s8 + $0x170] sm:$0xff] }
  0xd9   :  { %1335 = vmatprep.mubr.msk.f32.mxu1 %vm184_vm2, %v151_v46  ;;  %v540_v46 = vld [vmem:[%s2662_s8 + $0x58] sm:$0xff] }
  0xda   :  { %253 = vmatmul.mubr.f32.vlgmr.msra.gmra.mxu1 %v150_v47  ;;  %v617_v47 = vld [vmem:[%s2662_s8 + $0x2c0] sm:$0xff]  ;;  %694 = vmatprep.subr.mxu0 %v540_v46  ;;  %v574_v46 = vld [vmem:[%s2662_s8 + $0x168] sm:$0xff] }
  0xdb   :  { %455 = vmatpush1.msra.mxu1 %v323_v48  ;;  %1337 = vmatprep.mubr.msk.f32.mxu1 %vm379_vm1, %v260_v17  ;;  %v355_v17 = vld [vmem:[%s2660_s6 + $0x2f0] sm:$0xff] }
  0xdc   :  { %456 = vmatprep.subr.mxu1 %v320_v49  ;;  %v539_v48 = vld [vmem:[%s2662_s8 + $0x50] sm:$0xff]  ;;  %v616_v49 = vld [vmem:[%s2662_s8 + $0x2b8] sm:$0xff] }
  0xdd   :  { %457 = vmatpush1.msra.mxu1 %v319_v50  ;;  %v538_v50 = vld [vmem:[%s2662_s8 + $0x48] sm:$0xff]  ;;  %695 = vmatpush1.msra.mxu0 %v539_v48  ;;  %v573_v48 = vld [vmem:[%s2662_s8 + $0x160] sm:$0xff] }
  0xde   :  { %458 = vmatprep.subr.mxu1 %v316_v51  ;;  %v615_v51 = vld [vmem:[%s2662_s8 + $0x2b0] sm:$0xff]  ;;  %696 = vmatprep.subr.mxu0 %v538_v50  ;;  %v572_v50 = vld [vmem:[%s2662_s8 + $0x158] sm:$0xff] }
  0xdf   :  { %459 = vmatpush1.msra.mxu1 %v315_v52  ;;  %v537_v52 = vld [vmem:[%s2662_s8 + $0x40] sm:$0xff] }
  0xe0   :  { %460 = vmatprep.subr.mxu1 %v312_v53  ;;  %v614_v53 = vld [vmem:[%s2662_s8 + $0x2a8] sm:$0xff]  ;;  %697 = vmatpush1.msra.mxu0 %v537_v52  ;;  %v571_v52 = vld [vmem:[%s2662_s8 + $0x150] sm:$0xff] }
  0xe1   :  { %461 = vmatpush1.msra.mxu1 %v311_v54  ;;  %v536_v54 = vld [vmem:[%s2662_s8 + $0x38] sm:$0xff] }
  0xe2   :  { %462 = vmatprep.subr.mxu1 %v308_v55  ;;  %v613_v55 = vld [vmem:[%s2662_s8 + $0x2a0] sm:$0xff]  ;;  %698 = vmatprep.subr.mxu0 %v536_v54 }
  0xe3   :  { %463 = vmatpush1.msra.mxu1 %v307_v56  ;;  %v535_v56 = vld [vmem:[%s2662_s8 + $0x30] sm:$0xff]  ;;  %v2175_v54 = vld [vmem:[%s2661_s7] sm:$0xf] }
  0xe4   :  { %464 = vmatprep.subr.mxu1 %v304_v57  ;;  %v612_v57 = vld [vmem:[%s2662_s8 + $0x298] sm:$0xff]  ;;  %699 = vmatpush1.msra.mxu0 %v535_v56  ;;  %v641_v56 = vld [vmem:[%s2662_s8 + $0x380] sm:$0xff] }
  0xe5   :  { %465 = vmatpush1.msra.mxu1 %v303_v58  ;;  %v534_v58 = vld [vmem:[%s2662_s8 + $0x28] sm:$0xff] }
  0xe6   :  { %466 = vmatprep.subr.mxu1 %v300_v59  ;;  %v611_v59 = vld [vmem:[%s2662_s8 + $0x290] sm:$0xff]  ;;  %700 = vmatprep.subr.mxu0 %v534_v58  ;;  %v640_v58 = vld [vmem:[%s2662_s8 + $0x378] sm:$0xff] }
  0xe7   :  { %467 = vmatpush1.msra.mxu1 %v299_v60  ;;  %v533_v60 = vld [vmem:[%s2662_s8 + $0x20] sm:$0xff] }
  0xe8   :  { %468 = vmatprep.subr.mxu1 %v296_v61  ;;  %v610_v61 = vld [vmem:[%s2662_s8 + $0x288] sm:$0xff]  ;;  %701 = vmatpush1.msra.mxu0 %v533_v60  ;;  %v568_v60 = vld [vmem:[%s2662_s8 + $0x138] sm:$0xff] }
  0xe9   :  { %469 = vmatpush1.msra.mxu1 %v295_v62  ;;  %v532_v62 = vld [vmem:[%s2662_s8 + $0x18] sm:$0xff] }
  0xea   :  { %470 = vmatprep.subr.mxu1 %v292_v63  ;;  %v609_v63 = vld [vmem:[%s2662_s8 + $0x280] sm:$0xff]  ;;  %702 = vmatprep.subr.mxu0 %v532_v62  ;;  %v567_v62 = vld [vmem:[%s2662_s8 + $0x130] sm:$0xff] }
  0xeb   :  { %471 = vmatpush1.msra.mxu1 %v291_v1  ;;  %v531_v1 = vld [vmem:[%s2662_s8 + $0x10] sm:$0xff] }
  0xec   :  { %472 = vmatprep.subr.mxu1 %v288_v2  ;;  %v608_v2 = vld [vmem:[%s2662_s8 + $0x278] sm:$0xff]  ;;  %703 = vmatpush1.msra.mxu0 %v531_v1  ;;  %v366_v1 = vrot.slane %v2175_v54, %v1786_v39 }
  0xed   :  { %473 = vmatpush1.msra.mxu1 %v287_v3  ;;  %v530_v3 = vld [vmem:[%s2662_s8 + $0x8] sm:$0xff] }
  0xee   :  { %474 = vmatprep.subr.mxu1 %v284_v4  ;;  %v607_v4 = vld [vmem:[%s2662_s8 + $0x270] sm:$0xff]  ;;  %704 = vmatprep.subr.mxu0 %v530_v3  ;;  %v637_v3 = vld [vmem:[%s2662_s8 + $0x360] sm:$0xff] }
  0xef   :  { %475 = vmatpush1.msra.mxu1 %v283_v5  ;;  %v529_v5 = vld [vmem:[%s2662_s8] sm:$0xff] }
  0xf0   :  { %476 = vmatprep.subr.mxu1 %v280_v6  ;;  %v606_v6 = vld [vmem:[%s2662_s8 + $0x268] sm:$0xff]  ;;  %705 = vmatpush1.msra.mxu0 %v529_v5  ;;  %v565_v5 = vld [vmem:[%s2662_s8 + $0x120] sm:$0xff] }
  0xf1   :  { %477 = vmatpush1.msra.mxu1 %v279_v7  ;;  %v592_v7 = vld [vmem:[%s2662_s8 + $0x1f8] sm:$0xff] }
  0xf2   :  { %478 = vmatprep.subr.mxu1 %v276_v8  ;;  %v605_v8 = vld [vmem:[%s2662_s8 + $0x260] sm:$0xff]  ;;  %706 = vmatprep.subr.mxu0 %v592_v7 }
  0xf3   :  { %479 = vmatpush1.msra.mxu1 %v275_v9  ;;  %v591_v9 = vld [vmem:[%s2662_s8 + $0x1f0] sm:$0xff] }
  0xf4   :  { %480 = vmatprep.subr.mxu1 %v272_v10  ;;  %v604_v10 = vld [vmem:[%s2662_s8 + $0x258] sm:$0xff]  ;;  %707 = vmatpush2.msra.mxu0 %v591_v9  ;;  %v635_v9 = vld [vmem:[%s2662_s8 + $0x350] sm:$0xff] }
  0xf5   :  { %481 = vmatpush1.msra.mxu1 %v271_v11  ;;  %v590_v11 = vld [vmem:[%s2662_s8 + $0x1e8] sm:$0xff] }
  0xf6   :  { %482 = vmatprep.subr.mxu1 %v268_v12  ;;  %v603_v12 = vld [vmem:[%s2662_s8 + $0x250] sm:$0xff]  ;;  %708 = vmatprep.subr.mxu0 %v590_v11 }
  0xf7   :  { %483 = vmatpush1.msra.mxu1 %v267_v13  ;;  %v589_v13 = vld [vmem:[%s2662_s8 + $0x1e0] sm:$0xff]  ;;  %v563_v11 = vld [vmem:[%s2662_s8 + $0x110] sm:$0xff] }
  0xf8   :  { %484 = vmatprep.subr.mxu1 %v264_v14  ;;  %v602_v14 = vld [vmem:[%s2662_s8 + $0x248] sm:$0xff]  ;;  %709 = vmatpush2.msra.mxu0 %v589_v13 }
  0xf9   :  { %485 = vmatpush1.msra.mxu1 %v263_v15  ;;  %v588_v15 = vld [vmem:[%s2662_s8 + $0x1d8] sm:$0xff] }
  0xfa   :  { %502 = vmatprep.subr.mxu1 %v356_v16  ;;  %v601_v16 = vld [vmem:[%s2662_s8 + $0x240] sm:$0xff]  ;;  %710 = vmatprep.subr.mxu0 %v588_v15 }
  0xfb   :  { %503 = vmatpush2.msra.mxu1 %v355_v17  ;;  %v587_v17 = vld [vmem:[%s2662_s8 + $0x1d0] sm:$0xff]  ;;  %v633_v15 = vld [vmem:[%s2662_s8 + $0x340] sm:$0xff] }
  0xfc   :  { %504 = vmatprep.subr.mxu1 %v352_v19  ;;  %v600_v19 = vld [vmem:[%s2662_s8 + $0x238] sm:$0xff]  ;;  %711 = vmatpush2.msra.mxu0 %v587_v17 }
  0xfd   :  { %505 = vmatpush2.msra.mxu1 %v351_v20  ;;  %v586_v20 = vld [vmem:[%s2662_s8 + $0x1c8] sm:$0xff] }
  0xfe   :  { %506 = vmatprep.subr.mxu1 %v348_v21  ;;  %v599_v21 = vld [vmem:[%s2662_s8 + $0x230] sm:$0xff]  ;;  %712 = vmatprep.subr.mxu0 %v586_v20  ;;  %v632_v20 = vld [vmem:[%s2662_s8 + $0x338] sm:$0xff] }
  0xff   :  { %507 = vmatpush2.msra.mxu1 %v347_v22  ;;  %v585_v22 = vld [vmem:[%s2662_s8 + $0x1c0] sm:$0xff] }
 0x100   :  { %508 = vmatprep.subr.mxu1 %v344_v23  ;;  %v598_v23 = vld [vmem:[%s2662_s8 + $0x228] sm:$0xff]  ;;  %713 = vmatpush2.msra.mxu0 %v585_v22 }
 0x101   :  { %509 = vmatpush2.msra.mxu1 %v343_v24  ;;  %v584_v24 = vld [vmem:[%s2662_s8 + $0x1b8] sm:$0xff]  ;;  %v630_v22 = vld [vmem:[%s2662_s8 + $0x328] sm:$0xff] }
 0x102   :  { %510 = vmatprep.subr.mxu1 %v340_v25  ;;  %v597_v25 = vld [vmem:[%s2662_s8 + $0x220] sm:$0xff]  ;;  %714 = vmatprep.subr.mxu0 %v584_v24  ;;  %v628_v24 = vld [vmem:[%s2662_s8 + $0x318] sm:$0xff] }
 0x103   :  { %511 = vmatpush2.msra.mxu1 %v339_v26  ;;  %v583_v26 = vld [vmem:[%s2662_s8 + $0x1b0] sm:$0xff] }
 0x104   :  { %512 = vmatprep.subr.mxu1 %v336_v27  ;;  %v596_v27 = vld [vmem:[%s2662_s8 + $0x218] sm:$0xff]  ;;  %715 = vmatpush2.msra.mxu0 %v583_v26  ;;  %v626_v26 = vld [vmem:[%s2662_s8 + $0x308] sm:$0xff] }
 0x105   :  { %513 = vmatpush2.msra.mxu1 %v335_v28  ;;  %v582_v28 = vld [vmem:[%s2662_s8 + $0x1a8] sm:$0xff] }
 0x106   :  { %514 = vmatprep.subr.mxu1 %v332_v29  ;;  %v595_v29 = vld [vmem:[%s2662_s8 + $0x210] sm:$0xff]  ;;  %716 = vmatprep.subr.mxu0 %v582_v28  ;;  %v931_v28 = vld [vmem:[%s2665_s11 + $0x1e8] sm:$0xff] }
 0x107   :  { %515 = vmatpush2.msra.mxu1 %v331_v30  ;;  %v581_v30 = vld [vmem:[%s2662_s8 + $0x1a0] sm:$0xff] }
 0x108   :  { %516 = vmatprep.subr.mxu1 %v328_v31  ;;  %v594_v31 = vld [vmem:[%s2662_s8 + $0x208] sm:$0xff]  ;;  %717 = vmatpush2.msra.mxu0 %v581_v30  ;;  %v933_v30 = vld [vmem:[%s2665_s11 + $0x1f8] sm:$0xff] }
 0x109   :  { %517 = vmatpush2.msra.mxu1 %v327_v32  ;;  %v580_v32 = vld [vmem:[%s2662_s8 + $0x198] sm:$0xff] }
 0x10a   :  { %519 = vmatmul.mubr.f32.vlgmr.msra.gmra.mxu1 %v1726_v18  ;;  %745 = vmatprep.subr.mxu1 %v624_v33  ;;  %v620_v18 = vld [vmem:[%s2662_s8 + $0x2d8] sm:$0xff]  ;;  %v593_v33 = vld [vmem:[%s2662_s8 + $0x200] sm:$0xff] }
 0x10b   :  { %746 = vmatpush1.msra.mxu1 %v623_v34  ;;  %v579_v34 = vld [vmem:[%s2662_s8 + $0x190] sm:$0xff]  ;;  %718 = vmatprep.subr.mxu0 %v580_v32  ;;  %v926_v32 = vld [vmem:[%s2665_s11 + $0x1c0] sm:$0xff] }
 0x10c   :  { %747 = vmatprep.subr.mxu1 %v622_v35  ;;  %v650_v35 = vld [vmem:[%s2662_s8 + $0x3c8] sm:$0xf]  ;;  %719 = vmatpush2.msra.mxu0 %v579_v34  ;;  %v922_v34 = vld [vmem:[%s2665_s11 + $0x1a0] sm:$0xff] }
 0x10d   :  { %748 = vmatpush1.msra.mxu1 %v621_v40  ;;  %v649_v40 = vld [vmem:[%s2662_s8 + $0x3c0] sm:$0xf]  ;;  %720 = vmatprep.subr.mxu0 %v578_v38 }
 0x10e   :  { %749 = vmatprep.subr.mxu1 %v620_v18  ;;  %v648_v18 = vld [vmem:[%s2662_s8 + $0x3b8] sm:$0xff]  ;;  %721 = vmatpush2.msra.mxu0 %v577_v41  ;;  %v918_v38 = vld [vmem:[%s2665_s11 + $0x180] sm:$0xff] }
 0x10f   :  { %750 = vmatpush1.msra.mxu1 %v619_v43  ;;  %v647_v43 = vld [vmem:[%s2662_s8 + $0x3b0] sm:$0xff]  ;;  %722 = vmatprep.subr.mxu0 %v576_v42  ;;  %v914_v41 = vld [vmem:[%s2665_s11 + $0x160] sm:$0xff] }
 0x110   :  { %751 = vmatprep.subr.mxu1 %v618_v45  ;;  %v646_v45 = vld [vmem:[%s2662_s8 + $0x3a8] sm:$0xff]  ;;  %723 = vmatpush2.msra.mxu0 %v575_v44  ;;  %v910_v42 = vld [vmem:[%s2665_s11 + $0x140] sm:$0xff] }
 0x111   :  { %752 = vmatpush1.msra.mxu1 %v617_v47  ;;  %v645_v47 = vld [vmem:[%s2662_s8 + $0x3a0] sm:$0xff]  ;;  %724 = vmatprep.subr.mxu0 %v574_v46 }
 0x112   :  { %753 = vmatprep.subr.mxu1 %v616_v49  ;;  %v644_v49 = vld [vmem:[%s2662_s8 + $0x398] sm:$0xff]  ;;  %725 = vmatpush2.msra.mxu0 %v573_v48  ;;  %v906_v44 = vld [vmem:[%s2665_s11 + $0x120] sm:$0xff] }
 0x113   :  { %754 = vmatpush1.msra.mxu1 %v615_v51  ;;  %v643_v51 = vld [vmem:[%s2662_s8 + $0x390] sm:$0xff]  ;;  %726 = vmatprep.subr.mxu0 %v572_v50  ;;  %v902_v46 = vld [vmem:[%s2665_s11 + $0x100] sm:$0xff] }
 0x114   :  { %755 = vmatprep.subr.mxu1 %v614_v53  ;;  %v642_v53 = vld [vmem:[%s2662_s8 + $0x388] sm:$0xff]  ;;  %727 = vmatpush2.msra.mxu0 %v571_v52  ;;  %v898_v48 = vld [vmem:[%s2665_s11 + $0xe0] sm:$0xff] }
 0x115   :  { %756 = vmatpush1.msra.mxu1 %v613_v55  ;;  %v570_v55 = vld [vmem:[%s2662_s8 + $0x148] sm:$0xff]  ;;  %v894_v50 = vld [vmem:[%s2665_s11 + $0xc0] sm:$0xff] }
 0x116   :  { %757 = vmatprep.subr.mxu1 %v612_v57  ;;  %v569_v57 = vld [vmem:[%s2662_s8 + $0x140] sm:$0xff]  ;;  %728 = vmatprep.subr.mxu0 %v570_v55 }
 0x117   :  { %758 = vmatpush1.msra.mxu1 %v611_v59  ;;  %v362_v59 = vrot.slane %v2175_v54, %v1780_v37  ;;  %729 = vmatpush2.msra.mxu0 %v569_v57  ;;  %v890_v52 = vld [vmem:[%s2665_s11 + $0xa0] sm:$0xff] }
 0x118   :  { %759 = vmatprep.subr.mxu1 %v610_v61  ;;  %v639_v61 = vld [vmem:[%s2662_s8 + $0x370] sm:$0xff]  ;;  %730 = vmatprep.subr.mxu0 %v568_v60  ;;  %v886_v55 = vld [vmem:[%s2665_s11 + $0x80] sm:$0xff]  ;;  %v875_v60 = vld [vmem:[%s2665_s11 + $0x28] sm:$0xff] }
 0x119   :  { %760 = vmatpush1.msra.mxu1 %v609_v63  ;;  %v638_v63 = vld [vmem:[%s2662_s8 + $0x368] sm:$0xff]  ;;  %731 = vmatpush2.msra.mxu0 %v567_v62  ;;  %v882_v57 = vld [vmem:[%s2665_s11 + $0x60] sm:$0xff] }
 0x11a   :  { %761 = vmatprep.subr.mxu1 %v608_v2  ;;  %v566_v2 = vld [vmem:[%s2662_s8 + $0x128] sm:$0xff] }
 0x11b   :  { %762 = vmatpush1.msra.mxu1 %v607_v4  ;;  %v449_v4 = vpop.f32.mrf.mxu0  ;;  %732 = vmatprep.subr.mxu0 %v566_v2  ;;  %v871_v62 = vld [vmem:[%s2665_s11 + $0x8] sm:$0xff]  ;;  %v978_v2 = vld [vmem:[%s2665_s11 + $0x360] sm:$0xf] }
 0x11c   :  { %763 = vmatprep.subr.mxu1 %v606_v6  ;;  %v636_v6 = vld [vmem:[%s2662_s8 + $0x358] sm:$0xff]  ;;  %v450_v7 = vadd.f32 %v449_v4, %v362_v59  ;;  %733 = vmatpush2.msra.mxu0 %v565_v5  ;;  %v878_v59 = vld [vmem:[%s2665_s11 + $0x40] sm:$0xff]  ;;  %v971_v5 = vld [vmem:[%s2665_s11 + $0x328] sm:$0xff] }
 0x11d   :  { %764 = vmatpush1.msra.mxu1 %v605_v8  ;;  %v564_v8 = vld [vmem:[%s2662_s8 + $0x118] sm:$0xff]  ;;  %v974_v4 = vld [vmem:[%s2665_s11 + $0x340] sm:$0xff] }
 0x11e   :  { %765 = vmatprep.subr.mxu1 %v604_v10  ;;  %v451_v10 = vpop.f32.mrf.mxu0  ;;  %734 = vmatprep.subr.mxu0 %v564_v8  ;;  %v966_v8 = vld [vmem:[%s2665_s11 + $0x300] sm:$0xff] }
 0x11f   :  { %766 = vmatpush1.msra.mxu1 %v603_v12  ;;  %v634_v12 = vld [vmem:[%s2662_s8 + $0x348] sm:$0xff]  ;;  %v452_v13 = vadd.f32 %v451_v10, %v366_v1  ;;  %735 = vmatpush2.msra.mxu0 %v563_v11  ;;  %v962_v10 = vld [vmem:[%s2665_s11 + $0x2e0] sm:$0xff] }
 0x120   :  { %767 = vmatprep.subr.mxu1 %v602_v14  ;;  %v562_v14 = vld [vmem:[%s2662_s8 + $0x108] sm:$0xff] }
 0x121   :  { %768 = vmatpush1.msra.mxu1 %v601_v16  ;;  %v525_v16 = vmax.f32 %v450_v7, 0.0  ;;  %v526_v17 = vmax.f32 %v452_v13, 0.0  ;;  %736 = vmatprep.subr.mxu0 %v562_v14  ;;  %v979_v1 = vld [vmem:[%s2665_s11 + $0x368] sm:$0xf]  ;;  %v954_v14 = vld [vmem:[%s2665_s11 + $0x2a0] sm:$0xff] }
 0x122   :  { %769 = vmatprep.subr.mxu1 %v600_v19  ;;  %v561_v19 = vld [vmem:[%s2662_s8 + $0x100] sm:$0xff]  ;;  %v967_v7 = vld [vmem:[%s2665_s11 + $0x308] sm:$0xff] }
 0x123   :  { %770 = vmatpush1.msra.mxu1 %v599_v21  ;;  %737 = vmatpush2.msra.mxu0 %v561_v19  ;;  %v631_v21 = vld [vmem:[%s2662_s8 + $0x330] sm:$0xff]  ;;  %v959_v11 = vld [vmem:[%s2665_s11 + $0x2c8] sm:$0xff] }
 0x124   :  { %771 = vmatprep.subr.mxu1 %v598_v23  ;;  %738 = vmatprep.mubr.f32.mxu0 %v526_v17  ;;  %v629_v23 = vld [vmem:[%s2662_s8 + $0x320] sm:$0xff]  ;;  %v955_v13 = vld [vmem:[%s2665_s11 + $0x2a8] sm:$0xff] }
 0x125   :  { %772 = vmatpush1.msra.mxu1 %v597_v25  ;;  %739 = vmatmul.mubr.f32.vlgmr.msra.gmra.mxu0 %v525_v16  ;;  %v627_v25 = vld [vmem:[%s2662_s8 + $0x310] sm:$0xff]  ;;  %v950_v16 = vld [vmem:[%s2665_s11 + $0x280] sm:$0xff]  ;;  %v947_v17 = vld [vmem:[%s2665_s11 + $0x268] sm:$0xff] }
 0x126   :  { %773 = vmatprep.subr.mxu1 %v596_v27  ;;  %v625_v27 = vld [vmem:[%s2662_s8 + $0x300] sm:$0xff]  ;;  %998 = vmatprep.subr.mxu0 %v931_v28 }
 0x127   :  { %774 = vmatpush1.msra.mxu1 %v595_v29  ;;  %v930_v29 = vld [vmem:[%s2665_s11 + $0x1e0] sm:$0xff] }
 0x128   :  { %775 = vmatprep.subr.mxu1 %v594_v31  ;;  %v927_v31 = vld [vmem:[%s2665_s11 + $0x1c8] sm:$0xff]  ;;  %999 = vmatpush1.msra.mxu0 %v930_v29 }
 0x129   :  { %776 = vmatpush1.msra.mxu1 %v593_v33  ;;  %v923_v33 = vld [vmem:[%s2665_s11 + $0x1a8] sm:$0xff]  ;;  %1000 = vmatprep.subr.mxu0 %v927_v31  ;;  %v932_v31 = vld [vmem:[%s2665_s11 + $0x1f0] sm:$0xff] }
 0x12a   :  { %1338 = vmatprep.subr.msk.mxu1 %vm667_vm3, %v650_v35  ;;  %1001 = vmatpush1.msra.mxu0 %v926_v32  ;;  %v919_v35 = vld [vmem:[%s2665_s11 + $0x188] sm:$0xff]  ;;  %v929_v32 = vld [vmem:[%s2665_s11 + $0x1d8] sm:$0xff] }
 0x12b   :  { %1339 = vmatpush2.msk.msra.mxu1 %vm667_vm3, %v649_v40  ;;  %1002 = vmatprep.subr.mxu0 %v923_v33  ;;  %v915_v40 = vld [vmem:[%s2665_s11 + $0x168] sm:$0xff]  ;;  %v925_v33 = vld [vmem:[%s2665_s11 + $0x1b8] sm:$0xff] }
 0x12c   :  { %785 = vmatprep.subr.mxu1 %v648_v18  ;;  %1003 = vmatpush1.msra.mxu0 %v922_v34  ;;  %v911_v18 = vld [vmem:[%s2665_s11 + $0x148] sm:$0xff]  ;;  %v924_v34 = vld [vmem:[%s2665_s11 + $0x1b0] sm:$0xff] }
 0x12d   :  { %786 = vmatpush2.msra.mxu1 %v647_v43  ;;  %1004 = vmatprep.subr.mxu0 %v919_v35  ;;  %v907_v43 = vld [vmem:[%s2665_s11 + $0x128] sm:$0xff]  ;;  %v921_v35 = vld [vmem:[%s2665_s11 + $0x198] sm:$0xff] }
 0x12e   :  { %787 = vmatprep.subr.mxu1 %v646_v45  ;;  %1005 = vmatpush1.msra.mxu0 %v918_v38  ;;  %v903_v45 = vld [vmem:[%s2665_s11 + $0x108] sm:$0xff]  ;;  %v920_v38 = vld [vmem:[%s2665_s11 + $0x190] sm:$0xff] }
 0x12f   :  { %788 = vmatpush2.msra.mxu1 %v645_v47  ;;  %1006 = vmatprep.subr.mxu0 %v915_v40  ;;  %v899_v47 = vld [vmem:[%s2665_s11 + $0xe8] sm:$0xff]  ;;  %v917_v40 = vld [vmem:[%s2665_s11 + $0x178] sm:$0xff] }
 0x130   :  { %789 = vmatprep.subr.mxu1 %v644_v49  ;;  %1007 = vmatpush1.msra.mxu0 %v914_v41  ;;  %v895_v49 = vld [vmem:[%s2665_s11 + $0xc8] sm:$0xff]  ;;  %v916_v41 = vld [vmem:[%s2665_s11 + $0x170] sm:$0xff] }
 0x131   :  { %790 = vmatpush2.msra.mxu1 %v643_v51  ;;  %1008 = vmatprep.subr.mxu0 %v911_v18  ;;  %v891_v51 = vld [vmem:[%s2665_s11 + $0xa8] sm:$0xff]  ;;  %v913_v18 = vld [vmem:[%s2665_s11 + $0x158] sm:$0xff] }
 0x132   :  { %791 = vmatprep.subr.mxu1 %v642_v53  ;;  %1009 = vmatpush1.msra.mxu0 %v910_v42  ;;  %v887_v53 = vld [vmem:[%s2665_s11 + $0x88] sm:$0xff]  ;;  %v912_v42 = vld [vmem:[%s2665_s11 + $0x150] sm:$0xff] }
 0x133   :  { %792 = vmatpush2.msra.mxu1 %v641_v56  ;;  %1010 = vmatprep.subr.mxu0 %v907_v43  ;;  %v883_v56 = vld [vmem:[%s2665_s11 + $0x68] sm:$0xff]  ;;  %v909_v43 = vld [vmem:[%s2665_s11 + $0x138] sm:$0xff] }
 0x134   :  { %793 = vmatprep.subr.mxu1 %v640_v58  ;;  %1011 = vmatpush1.msra.mxu0 %v906_v44  ;;  %v879_v58 = vld [vmem:[%s2665_s11 + $0x48] sm:$0xff]  ;;  %v908_v44 = vld [vmem:[%s2665_s11 + $0x130] sm:$0xff] }
 0x135   :  { %794 = vmatpush2.msra.mxu1 %v639_v61  ;;  %1012 = vmatprep.subr.mxu0 %v903_v45  ;;  %v874_v61 = vld [vmem:[%s2665_s11 + $0x20] sm:$0xff]  ;;  %v905_v45 = vld [vmem:[%s2665_s11 + $0x118] sm:$0xff] }
 0x136   :  { %795 = vmatprep.subr.mxu1 %v638_v63  ;;  %1013 = vmatpush1.msra.mxu0 %v902_v46  ;;  %v870_v63 = vld [vmem:[%s2665_s11] sm:$0xff]  ;;  %v904_v46 = vld [vmem:[%s2665_s11 + $0x110] sm:$0xff] }
 0x137   :  { %796 = vmatpush2.msra.mxu1 %v637_v3  ;;  %1014 = vmatprep.subr.mxu0 %v899_v47  ;;  %v975_v3 = vld [vmem:[%s2665_s11 + $0x348] sm:$0xff]  ;;  %v901_v47 = vld [vmem:[%s2665_s11 + $0xf8] sm:$0xff] }
 0x138   :  { %797 = vmatprep.subr.mxu1 %v636_v6  ;;  %1015 = vmatpush1.msra.mxu0 %v898_v48  ;;  %v970_v6 = vld [vmem:[%s2665_s11 + $0x320] sm:$0xff]  ;;  %v900_v48 = vld [vmem:[%s2665_s11 + $0xf0] sm:$0xff] }
 0x139   :  { %798 = vmatpush2.msra.mxu1 %v635_v9  ;;  %1016 = vmatprep.subr.mxu0 %v895_v49  ;;  %v963_v9 = vld [vmem:[%s2665_s11 + $0x2e8] sm:$0xff]  ;;  %v897_v49 = vld [vmem:[%s2665_s11 + $0xd8] sm:$0xff] }
 0x13a   :  { %799 = vmatprep.subr.mxu1 %v634_v12  ;;  %1017 = vmatpush1.msra.mxu0 %v894_v50  ;;  %v958_v12 = vld [vmem:[%s2665_s11 + $0x2c0] sm:$0xff]  ;;  %v896_v50 = vld [vmem:[%s2665_s11 + $0xd0] sm:$0xff] }
 0x13b   :  { %800 = vmatpush2.msra.mxu1 %v633_v15  ;;  %1018 = vmatprep.subr.mxu0 %v891_v51  ;;  %v951_v15 = vld [vmem:[%s2665_s11 + $0x288] sm:$0xff]  ;;  %v893_v51 = vld [vmem:[%s2665_s11 + $0xb8] sm:$0xff] }
 0x13c   :  { %801 = vmatprep.subr.mxu1 %v632_v20  ;;  %1019 = vmatpush1.msra.mxu0 %v890_v52  ;;  %v892_v52 = vld [vmem:[%s2665_s11 + $0xb0] sm:$0xff] }
 0x13d   :  { %802 = vmatpush2.msra.mxu1 %v631_v21  ;;  %1020 = vmatprep.subr.mxu0 %v887_v53  ;;  %v369_v21 = vsub.s32 2, %v1777_v36  ;;  %v889_v53 = vld [vmem:[%s2665_s11 + $0x98] sm:$0xff] }
 0x13e   :  { %803 = vmatprep.subr.mxu1 %v630_v22  ;;  %1021 = vmatpush1.msra.mxu0 %v886_v55  ;;  %v373_v22 = vsub.s32 3, %v1777_v36  ;;  %v888_v55 = vld [vmem:[%s2665_s11 + $0x90] sm:$0xff] }
 0x13f   :  { %804 = vmatpush2.msra.mxu1 %v629_v23  ;;  %1022 = vmatprep.subr.mxu0 %v883_v56  ;;  %v370_v23 = vrot.slane %v2175_v54, %v369_v21  ;;  %v885_v56 = vld [vmem:[%s2665_s11 + $0x78] sm:$0xff] }
 0x140   :  { %805 = vmatprep.subr.mxu1 %v628_v24  ;;  %1023 = vmatpush1.msra.mxu0 %v882_v57  ;;  %v374_v24 = vrot.slane %v2175_v54, %v373_v22  ;;  %v928_v54 = vld [vmem:[%s2665_s11 + $0x1d0] sm:$0xff] }
 0x141   :  { %806 = vmatpush2.msra.mxu1 %v627_v25  ;;  %1024 = vmatprep.subr.mxu0 %v879_v58  ;;  %v884_v57 = vld [vmem:[%s2665_s11 + $0x70] sm:$0xff]  ;;  %v881_v58 = vld [vmem:[%s2665_s11 + $0x58] sm:$0xff] }
 0x142   :  { %807 = vmatprep.subr.mxu1 %v626_v26  ;;  %1025 = vmatpush1.msra.mxu0 %v878_v59  ;;  %v880_v59 = vld [vmem:[%s2665_s11 + $0x50] sm:$0xff] }
 0x143   :  { %808 = vmatpush2.msra.mxu1 %v625_v27  ;;  %1026 = vmatprep.subr.mxu0 %v875_v60  ;;  %v877_v60 = vld [vmem:[%s2665_s11 + $0x38] sm:$0xff] }
 0x144   :  { %1069 = vmatprep.subr.mxu1 %v933_v30  ;;  %1027 = vmatpush1.msra.mxu0 %v874_v61  ;;  %v876_v61 = vld [vmem:[%s2665_s11 + $0x30] sm:$0xff] }
 0x145   :  { %1028 = vmatprep.subr.mxu0 %v871_v62  ;;  %v873_v62 = vld [vmem:[%s2665_s11 + $0x18] sm:$0xff] }
 0x146   :  { %1029 = vmatpush1.msra.mxu0 %v870_v63  ;;  %v872_v63 = vld [vmem:[%s2665_s11 + $0x10] sm:$0xff] }
 0x147   :  { %1341 = vmatprep.subr.msk.mxu0 %vm667_vm3, %v979_v1  ;;  %v981_v1 = vld [vmem:[%s2665_s11 + $0x378] sm:$0xf] }
 0x148   :  { %1342 = vmatpush2.msk.msra.mxu0 %vm667_vm3, %v978_v2  ;;  %v980_v2 = vld [vmem:[%s2665_s11 + $0x370] sm:$0xf] }
 0x149   :  { %1040 = vmatprep.subr.mxu0 %v975_v3  ;;  %v977_v3 = vld [vmem:[%s2665_s11 + $0x358] sm:$0xff] }
 0x14a   :  { %1041 = vmatpush2.msra.mxu0 %v974_v4  ;;  %v976_v4 = vld [vmem:[%s2665_s11 + $0x350] sm:$0xff] }
 0x14b   :  { %1042 = vmatprep.subr.mxu0 %v971_v5  ;;  %v973_v5 = vld [vmem:[%s2665_s11 + $0x338] sm:$0xff] }
 0x14c   :  { %1043 = vmatpush2.msra.mxu0 %v970_v6  ;;  %v972_v6 = vld [vmem:[%s2665_s11 + $0x330] sm:$0xff] }
 0x14d   :  { %1044 = vmatprep.subr.mxu0 %v967_v7  ;;  %v969_v7 = vld [vmem:[%s2665_s11 + $0x318] sm:$0xff] }
 0x14e   :  { %1045 = vmatpush2.msra.mxu0 %v966_v8  ;;  %v968_v8 = vld [vmem:[%s2665_s11 + $0x310] sm:$0xff] }
 0x14f   :  { %1046 = vmatprep.subr.mxu0 %v963_v9  ;;  %v965_v9 = vld [vmem:[%s2665_s11 + $0x2f8] sm:$0xff] }
 0x150   :  { %1047 = vmatpush2.msra.mxu0 %v962_v10  ;;  %v964_v10 = vld [vmem:[%s2665_s11 + $0x2f0] sm:$0xff] }
 0x151   :  { %1048 = vmatprep.subr.mxu0 %v959_v11  ;;  %v961_v11 = vld [vmem:[%s2665_s11 + $0x2d8] sm:$0xff] }
 0x152   :  { %1049 = vmatpush2.msra.mxu0 %v958_v12  ;;  %v960_v12 = vld [vmem:[%s2665_s11 + $0x2d0] sm:$0xff] }
 0x153   :  { %1050 = vmatprep.subr.mxu0 %v955_v13  ;;  %v957_v13 = vld [vmem:[%s2665_s11 + $0x2b8] sm:$0xff] }
 0x154   :  { %1051 = vmatpush2.msra.mxu0 %v954_v14  ;;  %v956_v14 = vld [vmem:[%s2665_s11 + $0x2b0] sm:$0xff] }
 0x155   :  { %1052 = vmatprep.subr.mxu0 %v951_v15  ;;  %v953_v15 = vld [vmem:[%s2665_s11 + $0x298] sm:$0xff] }
 0x156   :  { %1053 = vmatpush2.msra.mxu0 %v950_v16  ;;  %v952_v16 = vld [vmem:[%s2665_s11 + $0x290] sm:$0xff] }
 0x157   :  { %1054 = vmatprep.subr.mxu0 %v947_v17  ;;  %v946_v17 = vld [vmem:[%s2665_s11 + $0x260] sm:$0xff] }
 0x158   :  { %1055 = vmatpush2.msra.mxu0 %v946_v17 }
 0x19a   :  { %v2414_v19 = vpop.f32.mrf.mxu1 }
 0x19c   :  { %v256_v20 = vpop.f32.mrf.mxu1 }
 0x19d   :  { %v949_v20 = vld [vmem:[%s2665_s11 + $0x278] sm:$0xff] }
 0x1ca   :  { %v520_v25 = vpop.f32.mrf.mxu1 }
 0x1cb   :  { %v521_v26 = vadd.f32 %v520_v25, %v370_v23  ;;  %v943_v23 = vld [vmem:[%s2665_s11 + $0x248] sm:$0xff]  ;;  %v942_v25 = vld [vmem:[%s2665_s11 + $0x240] sm:$0xff] }
 0x1cc   :  { %v522_v27 = vpop.f32.mrf.mxu1  ;;  %1056 = vmatprep.subr.mxu0 %v943_v23  ;;  %v865_v23 = vld [vmem:[#allocation2 + $0x178] sm:$0xff] }
 0x1cd   :  { %v523_v28 = vadd.f32 %v522_v27, %v374_v24  ;;  %v527_v30 = vmax.f32 %v521_v26, 0.0  ;;  %v948_v24 = vld [vmem:[%s2665_s11 + $0x270] sm:$0xff]  ;;  %v945_v26 = vld [vmem:[%s2665_s11 + $0x258] sm:$0xff]  ;;  %1057 = vmatpush2.msra.mxu0 %v942_v25  ;;  %v939_v27 = vld [vmem:[%s2665_s11 + $0x228] sm:$0xff] }
 0x1ce   :  { %1058 = vmatprep.subr.mxu0 %v939_v27  ;;  %v860_v25 = vld [vmem:[#allocation2 + $0x150] sm:$0xff] }
 0x1cf   :  { %v528_v29 = vmax.f32 %v523_v28, 0.0  ;;  %v944_v28 = vld [vmem:[%s2665_s11 + $0x250] sm:$0xff] }
 0x1d0   :  { %v856_v27 = vld [vmem:[#allocation2 + $0x130] sm:$0xff] }
 0x1d1   :  { %1340 = vmatprep.mubr.msk.f32.mxu1 %vm663_vm4, %v528_v29  ;;  %v938_v29 = vld [vmem:[%s2665_s11 + $0x220] sm:$0xff] }
 0x1d2   :  { %810 = vmatmul.mubr.f32.vlgmr.msra.gmra.mxu1 %v527_v30  ;;  %v941_v30 = vld [vmem:[%s2665_s11 + $0x238] sm:$0xff]  ;;  %1059 = vmatpush2.msra.mxu0 %v938_v29  ;;  %v852_v29 = vld [vmem:[#allocation2 + $0x110] sm:$0xff] }
 0x1d3   :  { %1070 = vmatpush1.msra.mxu1 %v932_v31  ;;  %v935_v31 = vld [vmem:[%s2665_s11 + $0x208] sm:$0xff] }
 0x1d4   :  { %1071 = vmatprep.subr.mxu1 %v929_v32  ;;  %v940_v32 = vld [vmem:[%s2665_s11 + $0x230] sm:$0xff]  ;;  %1060 = vmatprep.subr.mxu0 %v935_v31 }
 0x1d5   :  { %1072 = vmatpush1.msra.mxu1 %v928_v54  ;;  %v934_v54 = vld [vmem:[%s2665_s11 + $0x200] sm:$0xff]  ;;  %v848_v31 = vld [vmem:[#allocation2 + $0xf0] sm:$0xff] }
 0x1d6   :  { %1073 = vmatprep.subr.mxu1 %v925_v33  ;;  %v937_v33 = vld [vmem:[%s2665_s11 + $0x218] sm:$0xff]  ;;  %1061 = vmatpush2.msra.mxu0 %v934_v54  ;;  %v844_v54 = vld [vmem:[#allocation2 + $0xd0] sm:$0xff] }
 0x1d7   :  { %1074 = vmatpush1.msra.mxu1 %v924_v34  ;;  %v936_v34 = vld [vmem:[%s2665_s11 + $0x210] sm:$0xff] }
 0x1d8   :  { %1075 = vmatprep.subr.mxu1 %v921_v35  ;;  %v867_v35 = vld [vmem:[#allocation2 + $0x188] sm:$0xf] }
 0x1d9   :  { %1076 = vmatpush1.msra.mxu1 %v920_v38  ;;  %1347 = vmatprep.subr.msk.mxu0 %vm667_vm3, %v867_v35  ;;  %v651_v38 = vld [vmem:[%s2663_s9] sm:$0x3]  ;;  %v836_v35 = vld [vmem:[#allocation2 + $0x90] sm:$0xff] }
 0x1da   :  { %1077 = vmatprep.subr.mxu1 %v917_v40 }
 0x1db   :  { %1078 = vmatpush1.msra.mxu1 %v916_v41  ;;  %v656_v41 = vrot.slane %v651_v38, %v1780_v37 }
 0x1dc   :  { %1079 = vmatprep.subr.mxu1 %v913_v18  ;;  %v660_v18 = vrot.slane %v651_v38, %v1786_v39  ;;  %v833_v38 = vld [vmem:[#allocation2 + $0x78] sm:$0xff] }
 0x1dd   :  { %1080 = vmatpush1.msra.mxu1 %v912_v42 }
 0x1de   :  { %1081 = vmatprep.subr.mxu1 %v909_v43 }
 0x1df   :  { %1082 = vmatpush1.msra.mxu1 %v908_v44 }
 0x1e0   :  { %1083 = vmatprep.subr.mxu1 %v905_v45 }
 0x1e1   :  { %1084 = vmatpush1.msra.mxu1 %v904_v46 }
 0x1e2   :  { %1085 = vmatprep.subr.mxu1 %v901_v47 }
 0x1e3   :  { %1086 = vmatpush1.msra.mxu1 %v900_v48 }
 0x1e4   :  { %1087 = vmatprep.subr.mxu1 %v897_v49 }
 0x1e5   :  { %1088 = vmatpush1.msra.mxu1 %v896_v50  ;;  %v740_v40 = vpop.f32.mrf.mxu0 }
 0x1e6   :  { %1089 = vmatprep.subr.mxu1 %v893_v51  ;;  %v741_v43 = vadd.f32 %v740_v40, %v656_v41  ;;  %v866_v51 = vld [vmem:[#allocation2 + $0x180] sm:$0xf]  ;;  %v832_v40 = vld [vmem:[#allocation2 + $0x70] sm:$0xff]  ;;  %v829_v41 = vld [vmem:[#allocation2 + $0x58] sm:$0xff] }
 0x1e7   :  { %1090 = vmatpush1.msra.mxu1 %v892_v52  ;;  %v742_v42 = vpop.f32.mrf.mxu0  ;;  %v863_v52 = vld [vmem:[#allocation2 + $0x168] sm:$0xff] }
 0x1e8   :  { %1091 = vmatprep.subr.mxu1 %v889_v53  ;;  %v743_v45 = vadd.f32 %v742_v42, %v660_v18  ;;  %v862_v53 = vld [vmem:[#allocation2 + $0x160] sm:$0xff]  ;;  %v828_v18 = vld [vmem:[#allocation2 + $0x50] sm:$0xff]  ;;  %v825_v42 = vld [vmem:[#allocation2 + $0x38] sm:$0xff] }
 0x1e9   :  { %1092 = vmatpush1.msra.mxu1 %v888_v55  ;;  %v859_v55 = vld [vmem:[#allocation2 + $0x148] sm:$0xff] }
 0x1ea   :  { %1093 = vmatprep.subr.mxu1 %v885_v56  ;;  %v858_v56 = vld [vmem:[#allocation2 + $0x140] sm:$0xff] }
 0x1eb   :  { %1094 = vmatpush1.msra.mxu1 %v884_v57  ;;  %v855_v57 = vld [vmem:[#allocation2 + $0x128] sm:$0xff] }
 0x1ec   :  { %1095 = vmatprep.subr.mxu1 %v881_v58  ;;  %v854_v58 = vld [vmem:[#allocation2 + $0x120] sm:$0xff] }
 0x1ed   :  { %1096 = vmatpush1.msra.mxu1 %v880_v59  ;;  %v851_v59 = vld [vmem:[#allocation2 + $0x108] sm:$0xff] }
 0x1ee   :  { %1097 = vmatprep.subr.mxu1 %v877_v60  ;;  %v850_v60 = vld [vmem:[#allocation2 + $0x100] sm:$0xff] }
 0x1ef   :  { %1098 = vmatpush1.msra.mxu1 %v876_v61  ;;  %v847_v61 = vld [vmem:[#allocation2 + $0xe8] sm:$0xff] }
 0x1f0   :  { %1099 = vmatprep.subr.mxu1 %v873_v62  ;;  %v846_v62 = vld [vmem:[#allocation2 + $0xe0] sm:$0xff] }
 0x1f1   :  { %1100 = vmatpush1.msra.mxu1 %v872_v63  ;;  %v843_v63 = vld [vmem:[#allocation2 + $0xc8] sm:$0xff] }
 0x1f2   :  { %1344 = vmatprep.subr.msk.mxu1 %vm667_vm3, %v981_v1  ;;  %v842_v1 = vld [vmem:[#allocation2 + $0xc0] sm:$0xff] }
 0x1f3   :  { %1345 = vmatpush2.msk.msra.mxu1 %vm667_vm3, %v980_v2  ;;  %v839_v2 = vld [vmem:[#allocation2 + $0xa8] sm:$0xff] }
 0x1f4   :  { %1111 = vmatprep.subr.mxu1 %v977_v3  ;;  %v838_v3 = vld [vmem:[#allocation2 + $0xa0] sm:$0xff] }
 0x1f5   :  { %1112 = vmatpush2.msra.mxu1 %v976_v4  ;;  %v835_v4 = vld [vmem:[#allocation2 + $0x88] sm:$0xff] }
 0x1f6   :  { %1113 = vmatprep.subr.mxu1 %v973_v5  ;;  %v834_v5 = vld [vmem:[#allocation2 + $0x80] sm:$0xff] }
 0x1f7   :  { %1114 = vmatpush2.msra.mxu1 %v972_v6  ;;  %v831_v6 = vld [vmem:[#allocation2 + $0x68] sm:$0xff] }
 0x1f8   :  { %1115 = vmatprep.subr.mxu1 %v969_v7  ;;  %v830_v7 = vld [vmem:[#allocation2 + $0x60] sm:$0xff] }
 0x1f9   :  { %1116 = vmatpush2.msra.mxu1 %v968_v8  ;;  %v1334_v8 = vld [vmem:[%s2659_s5] ss:$0 sm:$0xff] }
 0x1fa   :  { %1117 = vmatprep.subr.mxu1 %v965_v9  ;;  %v827_v9 = vld [vmem:[#allocation2 + $0x48] sm:$0xff] }
 0x1fb   :  { %1118 = vmatpush2.msra.mxu1 %v964_v10  ;;  %v826_v10 = vld [vmem:[#allocation2 + $0x40] sm:$0xff] }
 0x1fc   :  { %1119 = vmatprep.subr.mxu1 %v961_v11  ;;  %v823_v11 = vld [vmem:[#allocation2 + $0x28] sm:$0xff] }
 0x1fd   :  { %1120 = vmatpush2.msra.mxu1 %v960_v12  ;;  %v2625_v12 = vadd.f32 %v1334_v8, %v2414_v19  ;;  %v864_v19 = vld [vmem:[#allocation2 + $0x170] sm:$0xff] }
 0x1fe   :  { %1121 = vmatprep.subr.mxu1 %v957_v13  ;;  %v822_v13 = vld [vmem:[#allocation2 + $0x20] sm:$0xff] }
 0x1ff   :  { %1122 = vmatpush2.msra.mxu1 %v956_v14  ;;  %v819_v14 = vld [vmem:[#allocation2 + $0x8] sm:$0xff]  ;;  %v258_v17 = vmax.f32 %v2625_v12, 0.0 }
 0x200   :  { %1123 = vmatprep.subr.mxu1 %v953_v15  ;;  %v818_v15 = vld [vmem:[#allocation2] sm:$0xff] }
 0x201   :  { %1124 = vmatpush2.msra.mxu1 %v952_v16  ;;  %v869_v16 = vld [vmem:[#allocation2 + $0x198] sm:$0xf] }
 0x202   :  { %1125 = vmatprep.subr.mxu1 %v949_v20  ;;  %v868_v20 = vld [vmem:[#allocation2 + $0x190] sm:$0xf] }
 0x203   :  { %1126 = vmatpush2.msra.mxu1 %v948_v24  ;;  %v861_v24 = vld [vmem:[#allocation2 + $0x158] sm:$0xff] }
 0x204   :  { %1127 = vmatprep.subr.mxu1 %v945_v26  ;;  %v857_v26 = vld [vmem:[#allocation2 + $0x138] sm:$0xff] }
 0x205   :  { %1128 = vmatpush2.msra.mxu1 %v944_v28  ;;  %v853_v28 = vld [vmem:[#allocation2 + $0x118] sm:$0xff] }
 0x206   :  { %1129 = vmatprep.subr.mxu1 %v941_v30  ;;  %v849_v30 = vld [vmem:[#allocation2 + $0xf8] sm:$0xff] }
 0x207   :  { %1130 = vmatpush2.msra.mxu1 %v940_v32  ;;  %v845_v32 = vld [vmem:[#allocation2 + $0xd8] sm:$0xff] }
 0x208   :  { %1131 = vmatprep.subr.mxu1 %v937_v33  ;;  %v840_v33 = vld [vmem:[#allocation2 + $0xb0] sm:$0xff] }
 0x209   :  { %1132 = vmatpush2.msra.mxu1 %v936_v34  ;;  %v837_v34 = vld [vmem:[#allocation2 + $0x98] sm:$0xff] }
 0x292   :  { %v811_v44 = vpop.f32.mrf.mxu1 }
 0x293   :  { %v812_v46 = vadd.f32 %v811_v44, %v741_v43  ;;  %v824_v43 = vld [vmem:[#allocation2 + $0x30] sm:$0xff]  ;;  %v821_v44 = vld [vmem:[#allocation2 + $0x18] sm:$0xff] }
 0x294   :  { %v813_v47 = vpop.f32.mrf.mxu1 }
 0x295   :  { %v814_v48 = vadd.f32 %v813_v47, %v743_v45  ;;  %v816_v50 = vmax.f32 %v812_v46, 0.0  ;;  %v820_v45 = vld [vmem:[#allocation2 + $0x10] sm:$0xff]  ;;  %v1297_v47 = vld [vmem:[%s2666_s12] sm:$0xf] }
 0x297   :  { %v817_v49 = vmax.f32 %v814_v48, 0.0 }
 0x299   :  { %1343 = vmatprep.mubr.msk.f32.mxu0 %vm982_vm5, %v817_v49  ;;  %1346 = vmatprep.mubr.msk.f32.mxu1 %vm982_vm5, %v817_v49  ;;  %v1302_v49 = vrot.slane %v1297_v47, %v1780_v37  ;;  %v1310_v37 = vrot.slane %v1297_v47, %v369_v21 }
 0x29a   :  { %1063 = vmatmul.mubr.f32.vlgmr.msra.gmra.mxu0 %v816_v50  ;;  %1134 = vmatmul.mubr.f32.vlgmr.msra.gmra.mxu1 %v816_v50 }
 0x29b   :  { %1348 = vmatpush1.msk.msra.mxu0 %vm667_vm3, %v866_v51  ;;  %1219 = vmatprep.mubr.f32.mxu0 %v1382_v0 }
 0x29c   :  { %1163 = vmatprep.subr.mxu0 %v863_v52  ;;  %v1306_v52 = vrot.slane %v1297_v47, %v1786_v39  ;;  %v1314_v39 = vrot.slane %v1297_v47, %v373_v22 }
 0x29d   :  { %1164 = vmatpush1.msra.mxu0 %v862_v53 }
 0x29e   :  { %1165 = vmatprep.subr.mxu0 %v859_v55 }
 0x29f   :  { %1166 = vmatpush1.msra.mxu0 %v858_v56 }
 0x2a0   :  { %1167 = vmatprep.subr.mxu0 %v855_v57 }
 0x2a1   :  { %1168 = vmatpush1.msra.mxu0 %v854_v58 }
 0x2a2   :  { %1169 = vmatprep.subr.mxu0 %v851_v59 }
 0x2a3   :  { %1170 = vmatpush1.msra.mxu0 %v850_v60 }
 0x2a4   :  { %1171 = vmatprep.subr.mxu0 %v847_v61 }
 0x2a5   :  { %1172 = vmatpush1.msra.mxu0 %v846_v62 }
 0x2a6   :  { %1173 = vmatprep.subr.mxu0 %v843_v63 }
 0x2a7   :  { %1174 = vmatpush1.msra.mxu0 %v842_v1 }
 0x2a8   :  { %1175 = vmatprep.subr.mxu0 %v839_v2 }
 0x2a9   :  { %1176 = vmatpush1.msra.mxu0 %v838_v3 }
 0x2aa   :  { %1177 = vmatprep.subr.mxu0 %v835_v4 }
 0x2ab   :  { %1178 = vmatpush1.msra.mxu0 %v834_v5 }
 0x2ac   :  { %1179 = vmatprep.subr.mxu0 %v831_v6 }
 0x2ad   :  { %1180 = vmatpush1.msra.mxu0 %v830_v7 }
 0x2ae   :  { %1181 = vmatprep.subr.mxu0 %v827_v9 }
 0x2af   :  { %1182 = vmatpush1.msra.mxu0 %v826_v10 }
 0x2b0   :  { %1183 = vmatprep.subr.mxu0 %v823_v11 }
 0x2b1   :  { %1184 = vmatpush1.msra.mxu0 %v822_v13 }
 0x2b2   :  { %1185 = vmatprep.subr.mxu0 %v819_v14 }
 0x2b3   :  { %1186 = vmatpush1.msra.mxu0 %v818_v15 }
 0x2b4   :  { %1349 = vmatmul.mubr.msk.f32.vlgmr.msra.gmra.mxu0 %vm663_vm4, %v258_v17  ;;  %1350 = vmatprep.subr.msk.mxu0 %vm667_vm3, %v869_v16 }
 0x2b5   :  { %1351 = vmatpush1.msk.msra.mxu0 %vm667_vm3, %v868_v20  ;;  %1290 = vmatprep.mubr.f32.mxu0 %v1382_v0  ;;  %v841_v0 = vld [vmem:[#allocation2 + $0xb8] sm:$0xff] }
 0x2b6   :  { %1234 = vmatprep.subr.mxu0 %v865_v23 }
 0x2b7   :  { %1235 = vmatpush1.msra.mxu0 %v864_v19 }
 0x2b8   :  { %1236 = vmatprep.subr.mxu0 %v861_v24 }
 0x2b9   :  { %1237 = vmatpush1.msra.mxu0 %v860_v25 }
 0x2ba   :  { %1238 = vmatprep.subr.mxu0 %v857_v26 }
 0x2bb   :  { %1239 = vmatpush1.msra.mxu0 %v856_v27 }
 0x2bc   :  { %1240 = vmatprep.subr.mxu0 %v853_v28 }
 0x2bd   :  { %1241 = vmatpush1.msra.mxu0 %v852_v29 }
 0x2be   :  { %1242 = vmatprep.subr.mxu0 %v849_v30 }
 0x2bf   :  { %1243 = vmatpush1.msra.mxu0 %v848_v31 }
 0x2c0   :  { %1244 = vmatprep.subr.mxu0 %v845_v32 }
 0x2c1   :  { %1245 = vmatpush1.msra.mxu0 %v844_v54 }
 0x2c2   :  { %1246 = vmatprep.subr.mxu0 %v841_v0 }
 0x2c3   :  { %1247 = vmatpush1.msra.mxu0 %v840_v33 }
 0x2c4   :  { %1248 = vmatprep.subr.mxu0 %v837_v34 }
 0x2c5   :  { %1249 = vmatpush1.msra.mxu0 %v836_v35 }
 0x2c6   :  { %1250 = vmatprep.subr.mxu0 %v833_v38 }
 0x2c7   :  { %1251 = vmatpush1.msra.mxu0 %v832_v40 }
 0x2c8   :  { %1252 = vmatprep.subr.mxu0 %v829_v41 }
 0x2c9   :  { %1253 = vmatpush1.msra.mxu0 %v828_v18 }
 0x2ca   :  { %1254 = vmatprep.subr.mxu0 %v825_v42 }
 0x2cb   :  { %1255 = vmatpush1.msra.mxu0 %v824_v43 }
 0x2cc   :  { %1256 = vmatprep.subr.mxu0 %v821_v44 }
 0x2cd   :  { %1257 = vmatpush1.msra.mxu0 %v820_v45 }
 0x2ce   :  { %1352 = vmatmul.mubr.msk.f32.vlgmr.msra.gmra.mxu0 %vm663_vm4, %v258_v17 }
 0x35a   :  { %v1064_v46 = vpop.f32.mrf.mxu0  ;;  %v1135_v58 = vpop.f32.mrf.mxu1 }
 0x35c   :  { %v1066_v48 = vpop.f32.mrf.mxu0  ;;  %v1137_v61 = vpop.f32.mrf.mxu1 }
 0x374   :  { %v1221_v50 = vpop.f32.mrf.mxu0 }
 0x375   :  { %v1222_v51 = vadd.f32 %v1221_v50, %v1064_v46 }
 0x376   :  { %v1223_v53 = vpop.f32.mrf.mxu0 }
 0x377   :  { %v1319_v55 = vadd.f32 %v1302_v49, %v1222_v51  ;;  %v1224_v56 = vadd.f32 %v1223_v53, %v1066_v48 }
 0x379   :  { %1323 = vst [vmem:[%s2667_s13] sm:$0xff] %v1319_v55  ;;  %v1320_v57 = vadd.f32 %v1306_v52, %v1224_v56 }
 0x37b   :  { %1324 = vst [vmem:[%s2667_s13 + $0x8] sm:$0xff] %v1320_v57 }
 0x38e   :  { %v1292_v59 = vpop.f32.mrf.mxu0 }
 0x38f   :  { %v1293_v60 = vadd.f32 %v1292_v59, %v1135_v58 }
 0x390   :  { %v1294_v62 = vpop.f32.mrf.mxu0 }
 0x391   :  { %v1321_v63 = vadd.f32 %v1310_v37, %v1293_v60  ;;  %v1295_v1 = vadd.f32 %v1294_v62, %v1137_v61 }
 0x393   :  { %1325 = vst [vmem:[%s2667_s13 + $0x10] sm:$0xff] %v1321_v63  ;;  %v1322_v2 = vadd.f32 %v1314_v39, %v1295_v1 }
 0x395   :  { %1327 = vst.msk [vmem:[%s2667_s13 + $0x18] sm:$0xff] %vm1326_vm6, %v1322_v2 }
 0x396   :  { %1332 = vsyncpa [#allocation3], 1 }

</bundles_post_ra>
